<compile_context>
chip_gen: v7x
topology: tpu7x:2x2x1
jax: 0.10.0
libtpu: 0.0.40
codegen_flags: <defaults>
</compile_context>

<pallas_src>
import jax
import jax.numpy as jnp
from jax.experimental import pallas as pl
from jax.experimental.pallas import tpu as pltpu

# ---- model dimensions (small, consistent with the module's forward) ----
B, T = 2, 4            # batch size, sequence length
N = 8                  # num_nodes
F_IN = 4               # input_dim
HID = 8                # hidden_dim (per head)
HEADS = 2              # attention heads
HC = HEADS * HID       # 16
LSTM_H = 32            # lstm_hidden_dim
NUM_CLASSES = 3
NEG_SLOPE = 0.2        # GATv2 leaky_relu default
G = B * T              # number of graphs
GN = G * N             # total node rows (64)
TN = T * N             # node rows per batch (32)
NEG_INF = -1e30


# ----------------------------------------------------------------------
# Fused kernel (one grid step per batch element)
# ----------------------------------------------------------------------
def gat_lstm_kernel(
        x_ref, xw_ref, ab_ref,                               # per-batch data
        q_ref, pmhc_ref, pmhid_ref, selg_ref,                # structure (0/1)
        rep_hc_ref, rep_hid_ref, a1_ref, a2_ref,
        onesblk_ref, bcatt_ref, sum1_ref, sum2_ref,
        wl1_ref, bl1_ref, wr1_ref, br1_ref, bias1_ref,       # GATv2 layer 1
        wl2_ref, bl2_ref, wr2_ref, br2_ref, bias2_ref,       # GATv2 layer 2
        wih_ref, whh_ref, blstm_ref, pre_ref, pmul_ref, padd_ref,  # LSTM
        wfc_ref, bfc_ref,                                    # FC
        out_ref):
    dot = lambda a, b: jnp.dot(a, b, preferred_element_type=jnp.float32)

    x = x_ref[...]            # (TN, F_IN)        node features
    xw = xw_ref[...]          # (TN, N*F_IN)      per-graph flattened + bcast
    adj_bias = ab_ref[...]    # (TN, HEADS*N)     additive {0, -1e30} mask
    q = q_ref[...]            # (TN, TN)          same-graph 0/1 matrix

    def masked_softmax_heads(s, a_mat):
        # s: (TN, N*HC) leaky_relu'd pair features; a_mat folds the att vector
        e = dot(s, a_mat) + adj_bias                 # (TN, HEADS*N) logits
        m = jnp.max(e, axis=1, keepdims=True)        # row max (valid per head)
        p = jnp.exp(e - m)                           # masked entries -> 0
        denom = dot(p, onesblk_ref[...])             # per-head sums on the MXU
        alpha = p / denom
        return dot(alpha, bcatt_ref[...])            # (TN, N*HC) head-broadcast

    # ---- GATv2 layer 1 (concat heads) + relu ----
    xl1_wide = dot(xw, wl1_ref[...]) + bl1_ref[...]          # src feats (wide)
    s1 = xl1_wide + dot(x, wr1_ref[...]) + br1_ref[...]      # + tgt feats
    s1 = jnp.maximum(s1, NEG_SLOPE * s1)                     # leaky_relu
    alpha1_w = masked_softmax_heads(s1, a1_ref[...])
    out1 = dot(alpha1_w * xl1_wide, sum1_ref[...])           # (TN, HC)
    h1 = jnp.maximum(out1 + bias1_ref[...], 0.0)

    # ---- GATv2 layer 2 (mean over heads) + relu ----
    xl2 = dot(h1, wl2_ref[...]) + bl2_ref[...]               # (TN, HC)
    # per-graph flatten + broadcast via MXU: Q @ ((xl2 @ Rep) * place_mask)
    xl2_wide = dot(q, dot(xl2, rep_hc_ref[...]) * pmhc_ref[...])
    s2 = xl2_wide + dot(h1, wr2_ref[...]) + br2_ref[...]
    s2 = jnp.maximum(s2, NEG_SLOPE * s2)
    alpha2_w = masked_softmax_heads(s2, a2_ref[...])
    out2 = dot(alpha2_w * xl2_wide, sum2_ref[...])           # (TN, HID), incl 1/HEADS
    node_h = jnp.maximum(out2 + bias2_ref[...], 0.0)

    # ---- per-graph flatten -> LSTM input projection (all timesteps) ----
    placed = dot(node_h, rep_hid_ref[...]) * pmhid_ref[...]  # (TN, N*HID)
    seq = dot(selg_ref[...], placed)                         # (T, N*HID)
    gates_x = dot(seq, wih_ref[...]) + blstm_ref[...]        # (T, 4*LSTM_H)

    # ---- LSTM over T (sequential dependence; one tanh per step) ----
    whh = whh_ref[...]
    pre = pre_ref[...]
    pmul = pmul_ref[...]
    padd = padd_ref[...]
    h = jnp.zeros((1, LSTM_H), jnp.float32)
    c = jnp.zeros((1, LSTM_H), jnp.float32)
    for t in range(T):                                       # static unroll
        gates = gates_x[t:t + 1, :] + dot(h, whh)            # (1, 4*LSTM_H)
        # sigmoid(x) = 0.5*(1 + tanh(x/2)); g lanes keep plain tanh
        act = jnp.tanh(gates * pre) * pmul + padd
        i_g = act[:, 0 * LSTM_H:1 * LSTM_H]
        f_g = act[:, 1 * LSTM_H:2 * LSTM_H]
        g_g = act[:, 2 * LSTM_H:3 * LSTM_H]
        o_g = act[:, 3 * LSTM_H:4 * LSTM_H]
        c = f_g * c + i_g * g_g
        h = o_g * jnp.tanh(c)

    out_ref[...] = (dot(h, wfc_ref[...]) + bfc_ref[...])[None]   # (1,1,NUM_CLASSES)


def run_gat_lstm(per_batch, shared):
    def batch_spec(a):
        blk = (a.shape[0] // B,) + a.shape[1:]
        nd = a.ndim
        return pl.BlockSpec(blk, lambda b, _nd=nd: (b,) + (0,) * (_nd - 1))

    def full_spec(a):
        nd = a.ndim
        return pl.BlockSpec(a.shape, lambda b, _nd=nd: (0,) * _nd)

    in_specs = [batch_spec(a) for a in per_batch] + [full_spec(a) for a in shared]
    out = pl.pallas_call(
        gat_lstm_kernel,
        out_shape=jax.ShapeDtypeStruct((B, 1, NUM_CLASSES), jnp.float32),
        grid=(B,),
        in_specs=in_specs,
        out_specs=pl.BlockSpec((1, 1, NUM_CLASSES), lambda b: (b, 0, 0)),
        compiler_params=pltpu.CompilerParams(dimension_semantics=("parallel",)),
    )(*per_batch, *shared)
    return out[:, 0, :]


# ----------------------------------------------------------------------
# Host-side layout plumbing: pack data + structural 0/1 matrices
# ----------------------------------------------------------------------
def prepare_inputs(x, adj, params):
    (wl1, bl1, wr1, br1, att1, bias1,
     wl2, bl2, wr2, br2, att2, bias2,
     wih_t, whh_t, b_lstm, wfc_t, bfc) = params

    f32 = jnp.float32
    eye_n = jnp.eye(N, dtype=f32)
    eye_t = jnp.eye(T, dtype=f32)
    eye_h = jnp.eye(HEADS, dtype=f32)

    # --- per-batch data (graph-major node rows: r = (b*T + t)*N + n) ---
    x_nodes = x.reshape(GN, F_IN)
    x_wide = jnp.repeat(x.reshape(G, N * F_IN), N, axis=0)           # (GN, N*F_IN)
    bias_adj = jnp.where(adj > 0, 0.0, NEG_INF).astype(f32)          # (B,T,N,N)
    adj_bias = jnp.tile(bias_adj.reshape(GN, N), (1, HEADS))         # (GN, HEADS*N)

    # --- batch-independent structure matrices (consumed on the MXU) ---
    q_local = jnp.kron(eye_t, jnp.ones((N, N), f32))                 # (TN, TN)
    pm_hc = jnp.tile(jnp.kron(eye_n, jnp.ones((1, HC), f32)), (T, 1))    # (TN, N*HC)
    pm_hid = jnp.tile(jnp.kron(eye_n, jnp.ones((1, HID), f32)), (T, 1))  # (TN, N*HID)
    selg = jnp.kron(eye_t, jnp.ones((1, N), f32))                    # (T, TN)
    rep_hc = jnp.tile(jnp.eye(HC, dtype=f32), (1, N))                # (HC, N*HC)
    rep_hid = jnp.tile(jnp.eye(HID, dtype=f32), (1, N))              # (HID, N*HID)
    ones_blk = jnp.kron(eye_h, jnp.ones((N, N), f32))                # (HEADS*N, HEADS*N)
    bcast_att = jnp.einsum('jk,hg,d->hjkgd', eye_n, eye_h,
                           jnp.ones((HID,), f32)).reshape(HEADS * N, N * HC)
    sum1 = jnp.tile(jnp.eye(HC, dtype=f32), (N, 1))                  # (N*HC, HC)
    sum2 = jnp.tile(jnp.eye(HID, dtype=f32), (N * HEADS, 1)) / HEADS  # (N*HC, HID)

    def att_reduce_mat(att):
        blk = jnp.zeros((HC, HEADS), f32)
        for h in range(HEADS):
            blk = blk.at[h * HID:(h + 1) * HID, h].set(att[h])
        return jnp.einsum('ch,jk->jchk', blk, eye_n).reshape(N * HC, HEADS * N)

    a1 = att_reduce_mat(att1)
    a2 = att_reduce_mat(att2)

    # --- weights in kernel-ready layouts ---
    wl1_bd = jnp.kron(eye_n, wl1)                                    # (N*F_IN, N*HC)
    bl1_rep = jnp.tile(bl1, (1, N))
    wr1_rep = jnp.tile(wr1, (1, N))
    br1_rep = jnp.tile(br1, (1, N))
    wr2_rep = jnp.tile(wr2, (1, N))
    br2_rep = jnp.tile(br2, (1, N))

    # LSTM single-tanh activation affines (i,f,o lanes -> sigmoid; g -> tanh)
    lane = jnp.arange(4 * LSTM_H)
    is_g = (lane >= 2 * LSTM_H) & (lane < 3 * LSTM_H)
    pre = jnp.where(is_g, 1.0, 0.5).astype(f32)[None, :]
    pmul = jnp.where(is_g, 1.0, 0.5).astype(f32)[None, :]
    padd = jnp.where(is_g, 0.0, 0.5).astype(f32)[None, :]

    per_batch = [x_nodes, x_wide, adj_bias]
    shared = [q_local, pm_hc, pm_hid, selg, rep_hc, rep_hid, a1, a2,
              ones_blk, bcast_att, sum1, sum2,
              wl1_bd, bl1_rep, wr1_rep, br1_rep, bias1,
              wl2, bl2, wr2_rep, br2_rep, bias2,
              wih_t, whh_t, b_lstm, pre, pmul, padd, wfc_t, bfc]
    return per_batch, shared


# ----------------------------------------------------------------------
# Pure-JAX reference (straightforward GATv2 / LSTM, for correctness check)
# ----------------------------------------------------------------------
def reference_forward(x, adj, params):
    (wl1, bl1, wr1, br1, att1, bias1,
     wl2, bl2, wr2, br2, att2, bias2,
     wih_t, whh_t, b_lstm, wfc_t, bfc) = params

    def gatv2(h, a, wl, bl, wr, br, att, bias, concat):
        xl = h @ wl + bl
        xr = h @ wr + br
        outs = []
        for hd in range(HEADS):
            xl_h = xl[:, hd * HID:(hd + 1) * HID]
            xr_h = xr[:, hd * HID:(hd + 1) * HID]
            s = xr_h[:, None, :] + xl_h[None, :, :]
            s = jnp.where(s > 0, s, NEG_SLOPE * s)
            e = jnp.einsum('ijd,d->ij', s, att[hd])
            e = jnp.where(a > 0, e, -jnp.inf)
            p = jax.nn.softmax(e, axis=1)
            outs.append(p @ xl_h)
        o = jnp.concatenate(outs, axis=1) if concat else sum(outs) / HEADS
        return o + bias

    seq = []
    for b in range(B):
        rows = []
        for t in range(T):
            h1 = jax.nn.relu(gatv2(x[b, t], adj[b, t], wl1, bl1, wr1, br1,
                                   att1, bias1, True))
            h2 = jax.nn.relu(gatv2(h1, adj[b, t], wl2, bl2, wr2, br2,
                                   att2, bias2, False))
            rows.append(h2.reshape(-1))
        seq.append(jnp.stack(rows))
    seq = jnp.stack(seq)                                   # (B, T, N*HID)

    h = jnp.zeros((B, LSTM_H), jnp.float32)
    c = jnp.zeros((B, LSTM_H), jnp.float32)
    for t in range(T):
        g = seq[:, t] @ wih_t + h @ whh_t + b_lstm
        i_g = jax.nn.sigmoid(g[:, 0 * LSTM_H:1 * LSTM_H])
        f_g = jax.nn.sigmoid(g[:, 1 * LSTM_H:2 * LSTM_H])
        g_g = jnp.tanh(g[:, 2 * LSTM_H:3 * LSTM_H])
        o_g = jax.nn.sigmoid(g[:, 3 * LSTM_H:4 * LSTM_H])
        c = f_g * c + i_g * g_g
        h = o_g * jnp.tanh(c)
    return h @ wfc_t + bfc


# ----------------------------------------------------------------------
if __name__ == "__main__":
    key = jax.random.PRNGKey(0)
    ks = jax.random.split(key, 20)

    def rnd(k, shape, scale=0.1):
        return (scale * jax.random.normal(k, shape)).astype(jnp.float32)

    # GATv2 parameters (lin weights stored as (in, out))
    wl1, bl1 = rnd(ks[0], (F_IN, HC)), rnd(ks[1], (1, HC))
    wr1, br1 = rnd(ks[2], (F_IN, HC)), rnd(ks[3], (1, HC))
    att1, bias1 = rnd(ks[4], (HEADS, HID)), rnd(ks[5], (1, HC))
    wl2, bl2 = rnd(ks[6], (HC, HC)), rnd(ks[7], (1, HC))
    wr2, br2 = rnd(ks[8], (HC, HC)), rnd(ks[9], (1, HC))
    att2, bias2 = rnd(ks[10], (HEADS, HID)), rnd(ks[11], (1, HID))

    # LSTM + FC parameters (weights pre-transposed; bias = b_ih + b_hh)
    wih_t = rnd(ks[12], (N * HID, 4 * LSTM_H))
    whh_t = rnd(ks[13], (LSTM_H, 4 * LSTM_H))
    b_lstm = rnd(ks[14], (1, 4 * LSTM_H))
    wfc_t = rnd(ks[15], (LSTM_H, NUM_CLASSES))
    bfc = rnd(ks[16], (1, NUM_CLASSES))

    params = (wl1, bl1, wr1, br1, att1, bias1,
              wl2, bl2, wr2, br2, att2, bias2,
              wih_t, whh_t, b_lstm, wfc_t, bfc)

    # Inputs: node features and per-graph adjacency (adj[b,t,i,j]=1 => edge j->i).
    x = rnd(ks[17], (B, T, N, F_IN), scale=1.0)
    adj = (jax.random.uniform(ks[18], (B, T, N, N)) < 0.3).astype(jnp.float32)
    # Self-loops are required (GATv2Conv adds them by default); they also
    # guarantee every softmax row has at least one unmasked entry.
    adj = jnp.maximum(adj, jnp.eye(N, dtype=jnp.float32)[None, None])

    @jax.jit
    def forward(x, adj):
        per_batch, shared = prepare_inputs(x, adj, params)
        return run_gat_lstm(per_batch, shared)

    out = jax.block_until_ready(forward(x, adj))
    ref = jax.block_until_ready(reference_forward(x, adj, params))
    assert out.shape == (B, NUM_CLASSES) and out.dtype == jnp.float32
    assert jnp.allclose(out, ref, atol=1e-3, rtol=1e-3), (out, ref)
    print("KERNEL_OK")
</pallas_src>

<mosaic_0001>
module attributes {stable_mosaic.version = 11 : i64} {
  func.func @gat_lstm_kernel(%arg0: i32, %arg1: memref<32x4xf32, #tpu.memory_space<vmem>>, %arg2: memref<32x32xf32, #tpu.memory_space<vmem>>, %arg3: memref<32x16xf32, #tpu.memory_space<vmem>>, %arg4: memref<32x32xf32, #tpu.memory_space<vmem>>, %arg5: memref<32x128xf32, #tpu.memory_space<vmem>>, %arg6: memref<32x64xf32, #tpu.memory_space<vmem>>, %arg7: memref<4x32xf32, #tpu.memory_space<vmem>>, %arg8: memref<16x128xf32, #tpu.memory_space<vmem>>, %arg9: memref<8x64xf32, #tpu.memory_space<vmem>>, %arg10: memref<128x16xf32, #tpu.memory_space<vmem>>, %arg11: memref<128x16xf32, #tpu.memory_space<vmem>>, %arg12: memref<16x16xf32, #tpu.memory_space<vmem>>, %arg13: memref<16x128xf32, #tpu.memory_space<vmem>>, %arg14: memref<128x16xf32, #tpu.memory_space<vmem>>, %arg15: memref<128x8xf32, #tpu.memory_space<vmem>>, %arg16: memref<32x128xf32, #tpu.memory_space<vmem>>, %arg17: memref<1x128xf32, #tpu.memory_space<vmem>>, %arg18: memref<4x128xf32, #tpu.memory_space<vmem>>, %arg19: memref<1x128xf32, #tpu.memory_space<vmem>>, %arg20: memref<1x16xf32, #tpu.memory_space<vmem>>, %arg21: memref<16x16xf32, #tpu.memory_space<vmem>>, %arg22: memref<1x16xf32, #tpu.memory_space<vmem>>, %arg23: memref<16x128xf32, #tpu.memory_space<vmem>>, %arg24: memref<1x128xf32, #tpu.memory_space<vmem>>, %arg25: memref<1x8xf32, #tpu.memory_space<vmem>>, %arg26: memref<64x128xf32, #tpu.memory_space<vmem>>, %arg27: memref<32x128xf32, #tpu.memory_space<vmem>>, %arg28: memref<1x128xf32, #tpu.memory_space<vmem>>, %arg29: memref<1x128xf32, #tpu.memory_space<vmem>>, %arg30: memref<1x128xf32, #tpu.memory_space<vmem>>, %arg31: memref<1x128xf32, #tpu.memory_space<vmem>>, %arg32: memref<32x3xf32, #tpu.memory_space<vmem>>, %arg33: memref<1x3xf32, #tpu.memory_space<vmem>>, %arg34: memref<1x1x3xf32, #tpu.memory_space<vmem>>) attributes {dimension_semantics = [#tpu.dimension_semantics<parallel>], iteration_bounds = array<i64: 2>, scalar_prefetch = 0 : i64, scratch_operands = 0 : i64, tpu.core_type = #tpu.core_type<tc>, window_params = [{transform_indices = @transform_0, window_bounds = array<i64: 32, 4>}, {transform_indices = @transform_1, window_bounds = array<i64: 32, 32>}, {transform_indices = @transform_2, window_bounds = array<i64: 32, 16>}, {pipeline_mode = #tpu.pipeline_mode<synchronous>, transform_indices = @transform_3, window_bounds = array<i64: 32, 32>}, {pipeline_mode = #tpu.pipeline_mode<synchronous>, transform_indices = @transform_4, window_bounds = array<i64: 32, 128>}, {pipeline_mode = #tpu.pipeline_mode<synchronous>, transform_indices = @transform_5, window_bounds = array<i64: 32, 64>}, {pipeline_mode = #tpu.pipeline_mode<synchronous>, transform_indices = @transform_6, window_bounds = array<i64: 4, 32>}, {pipeline_mode = #tpu.pipeline_mode<synchronous>, transform_indices = @transform_7, window_bounds = array<i64: 16, 128>}, {pipeline_mode = #tpu.pipeline_mode<synchronous>, transform_indices = @transform_8, window_bounds = array<i64: 8, 64>}, {pipeline_mode = #tpu.pipeline_mode<synchronous>, transform_indices = @transform_9, window_bounds = array<i64: 128, 16>}, {pipeline_mode = #tpu.pipeline_mode<synchronous>, transform_indices = @transform_10, window_bounds = array<i64: 128, 16>}, {pipeline_mode = #tpu.pipeline_mode<synchronous>, transform_indices = @transform_11, window_bounds = array<i64: 16, 16>}, {pipeline_mode = #tpu.pipeline_mode<synchronous>, transform_indices = @transform_12, window_bounds = array<i64: 16, 128>}, {pipeline_mode = #tpu.pipeline_mode<synchronous>, transform_indices = @transform_13, window_bounds = array<i64: 128, 16>}, {pipeline_mode = #tpu.pipeline_mode<synchronous>, transform_indices = @transform_14, window_bounds = array<i64: 128, 8>}, {pipeline_mode = #tpu.pipeline_mode<synchronous>, transform_indices = @transform_15, window_bounds = array<i64: 32, 128>}, {pipeline_mode = #tpu.pipeline_mode<synchronous>, transform_indices = @transform_16, window_bounds = array<i64: 1, 128>}, {pipeline_mode = #tpu.pipeline_mode<synchronous>, transform_indices = @transform_17, window_bounds = array<i64: 4, 128>}, {pipeline_mode = #tpu.pipeline_mode<synchronous>, transform_indices = @transform_18, window_bounds = array<i64: 1, 128>}, {pipeline_mode = #tpu.pipeline_mode<synchronous>, transform_indices = @transform_19, window_bounds = array<i64: 1, 16>}, {pipeline_mode = #tpu.pipeline_mode<synchronous>, transform_indices = @transform_20, window_bounds = array<i64: 16, 16>}, {pipeline_mode = #tpu.pipeline_mode<synchronous>, transform_indices = @transform_21, window_bounds = array<i64: 1, 16>}, {pipeline_mode = #tpu.pipeline_mode<synchronous>, transform_indices = @transform_22, window_bounds = array<i64: 16, 128>}, {pipeline_mode = #tpu.pipeline_mode<synchronous>, transform_indices = @transform_23, window_bounds = array<i64: 1, 128>}, {pipeline_mode = #tpu.pipeline_mode<synchronous>, transform_indices = @transform_24, window_bounds = array<i64: 1, 8>}, {pipeline_mode = #tpu.pipeline_mode<synchronous>, transform_indices = @transform_25, window_bounds = array<i64: 64, 128>}, {pipeline_mode = #tpu.pipeline_mode<synchronous>, transform_indices = @transform_26, window_bounds = array<i64: 32, 128>}, {pipeline_mode = #tpu.pipeline_mode<synchronous>, transform_indices = @transform_27, window_bounds = array<i64: 1, 128>}, {pipeline_mode = #tpu.pipeline_mode<synchronous>, transform_indices = @transform_28, window_bounds = array<i64: 1, 128>}, {pipeline_mode = #tpu.pipeline_mode<synchronous>, transform_indices = @transform_29, window_bounds = array<i64: 1, 128>}, {pipeline_mode = #tpu.pipeline_mode<synchronous>, transform_indices = @transform_30, window_bounds = array<i64: 1, 128>}, {pipeline_mode = #tpu.pipeline_mode<synchronous>, transform_indices = @transform_31, window_bounds = array<i64: 32, 3>}, {pipeline_mode = #tpu.pipeline_mode<synchronous>, transform_indices = @transform_32, window_bounds = array<i64: 1, 3>}, {transform_indices = @transform_33, window_bounds = array<i64: 1, 1, 3>}]} {
    %c0 = arith.constant 0 : index
    %c0_0 = arith.constant 0 : index
    %0 = vector.load %arg1[%c0, %c0_0] : memref<32x4xf32, #tpu.memory_space<vmem>>, vector<32x4xf32>
    %c0_1 = arith.constant 0 : index
    %c0_2 = arith.constant 0 : index
    %1 = vector.load %arg2[%c0_1, %c0_2] : memref<32x32xf32, #tpu.memory_space<vmem>>, vector<32x32xf32>
    %c0_3 = arith.constant 0 : index
    %c0_4 = arith.constant 0 : index
    %2 = vector.load %arg3[%c0_3, %c0_4] : memref<32x16xf32, #tpu.memory_space<vmem>>, vector<32x16xf32>
    %c0_5 = arith.constant 0 : index
    %c0_6 = arith.constant 0 : index
    %3 = vector.load %arg4[%c0_5, %c0_6] : memref<32x32xf32, #tpu.memory_space<vmem>>, vector<32x32xf32>
    %c0_7 = arith.constant 0 : index
    %c0_8 = arith.constant 0 : index
    %4 = vector.load %arg16[%c0_7, %c0_8] : memref<32x128xf32, #tpu.memory_space<vmem>>, vector<32x128xf32>
    %cst = arith.constant dense<0.000000e+00> : vector<32x128xf32>
    %5 = tpu.matmul %1, %4, %cst {dimension_numbers = #tpu.dot_dimension_numbers<[1], [0], [0], [1], [0, 0, 1, 1], [], []>} : vector<32x32xf32>, vector<32x128xf32>, vector<32x128xf32> -> vector<32x128xf32>
    %c0_9 = arith.constant 0 : index
    %c0_10 = arith.constant 0 : index
    %6 = vector.load %arg17[%c0_9, %c0_10] : memref<1x128xf32, #tpu.memory_space<vmem>>, vector<1x128xf32>
    %7 = vector.broadcast %6 : vector<1x128xf32> to vector<32x128xf32>
    %8 = arith.addf %5, %7 : vector<32x128xf32>
    %c0_11 = arith.constant 0 : index
    %c0_12 = arith.constant 0 : index
    %9 = vector.load %arg18[%c0_11, %c0_12] : memref<4x128xf32, #tpu.memory_space<vmem>>, vector<4x128xf32>
    %cst_13 = arith.constant dense<0.000000e+00> : vector<32x128xf32>
    %10 = tpu.matmul %0, %9, %cst_13 {dimension_numbers = #tpu.dot_dimension_numbers<[1], [0], [0], [1], [0, 0, 1, 1], [], []>} : vector<32x4xf32>, vector<4x128xf32>, vector<32x128xf32> -> vector<32x128xf32>
    %11 = arith.addf %8, %10 : vector<32x128xf32>
    %c0_14 = arith.constant 0 : index
    %c0_15 = arith.constant 0 : index
    %12 = vector.load %arg19[%c0_14, %c0_15] : memref<1x128xf32, #tpu.memory_space<vmem>>, vector<1x128xf32>
    %13 = vector.broadcast %12 : vector<1x128xf32> to vector<32x128xf32>
    %14 = arith.addf %11, %13 : vector<32x128xf32>
    %cst_16 = arith.constant 2.000000e-01 : f32
    %15 = vector.broadcast %cst_16 : f32 to vector<32x128xf32>
    %16 = arith.mulf %15, %14 : vector<32x128xf32>
    %17 = arith.maximumf %14, %16 : vector<32x128xf32>
    %c0_17 = arith.constant 0 : index
    %c0_18 = arith.constant 0 : index
    %18 = vector.load %arg10[%c0_17, %c0_18] : memref<128x16xf32, #tpu.memory_space<vmem>>, vector<128x16xf32>
    %cst_19 = arith.constant dense<0.000000e+00> : vector<32x16xf32>
    %19 = tpu.matmul %17, %18, %cst_19 {dimension_numbers = #tpu.dot_dimension_numbers<[1], [0], [0], [1], [0, 0, 1, 1], [], []>} : vector<32x128xf32>, vector<128x16xf32>, vector<32x16xf32> -> vector<32x16xf32>
    %20 = arith.addf %19, %2 : vector<32x16xf32>
    %cst_20 = arith.constant dense<0xFF800000> : vector<32xf32>
    %21 = vector.multi_reduction <maximumf>, %20, %cst_20 [1] : vector<32x16xf32> to vector<32xf32>
    %22 = vector.shape_cast %21 : vector<32xf32> to vector<32x1xf32>
    %23 = vector.broadcast %22 : vector<32x1xf32> to vector<32x16xf32>
    %24 = arith.subf %20, %23 : vector<32x16xf32>
    %25 = math.exp %24 : vector<32x16xf32>
    %c0_21 = arith.constant 0 : index
    %c0_22 = arith.constant 0 : index
    %26 = vector.load %arg12[%c0_21, %c0_22] : memref<16x16xf32, #tpu.memory_space<vmem>>, vector<16x16xf32>
    %cst_23 = arith.constant dense<0.000000e+00> : vector<32x16xf32>
    %27 = tpu.matmul %25, %26, %cst_23 {dimension_numbers = #tpu.dot_dimension_numbers<[1], [0], [0], [1], [0, 0, 1, 1], [], []>} : vector<32x16xf32>, vector<16x16xf32>, vector<32x16xf32> -> vector<32x16xf32>
    %28 = arith.divf %25, %27 : vector<32x16xf32>
    %c0_24 = arith.constant 0 : index
    %c0_25 = arith.constant 0 : index
    %29 = vector.load %arg13[%c0_24, %c0_25] : memref<16x128xf32, #tpu.memory_space<vmem>>, vector<16x128xf32>
    %cst_26 = arith.constant dense<0.000000e+00> : vector<32x128xf32>
    %30 = tpu.matmul %28, %29, %cst_26 {dimension_numbers = #tpu.dot_dimension_numbers<[1], [0], [0], [1], [0, 0, 1, 1], [], []>} : vector<32x16xf32>, vector<16x128xf32>, vector<32x128xf32> -> vector<32x128xf32>
    %31 = arith.mulf %30, %8 : vector<32x128xf32>
    %c0_27 = arith.constant 0 : index
    %c0_28 = arith.constant 0 : index
    %32 = vector.load %arg14[%c0_27, %c0_28] : memref<128x16xf32, #tpu.memory_space<vmem>>, vector<128x16xf32>
    %cst_29 = arith.constant dense<0.000000e+00> : vector<32x16xf32>
    %33 = tpu.matmul %31, %32, %cst_29 {dimension_numbers = #tpu.dot_dimension_numbers<[1], [0], [0], [1], [0, 0, 1, 1], [], []>} : vector<32x128xf32>, vector<128x16xf32>, vector<32x16xf32> -> vector<32x16xf32>
    %c0_30 = arith.constant 0 : index
    %c0_31 = arith.constant 0 : index
    %34 = vector.load %arg20[%c0_30, %c0_31] : memref<1x16xf32, #tpu.memory_space<vmem>>, vector<1x16xf32>
    %35 = vector.broadcast %34 : vector<1x16xf32> to vector<32x16xf32>
    %36 = arith.addf %33, %35 : vector<32x16xf32>
    %cst_32 = arith.constant 0.000000e+00 : f32
    %37 = vector.broadcast %cst_32 : f32 to vector<32x16xf32>
    %38 = arith.maximumf %36, %37 : vector<32x16xf32>
    %c0_33 = arith.constant 0 : index
    %c0_34 = arith.constant 0 : index
    %39 = vector.load %arg21[%c0_33, %c0_34] : memref<16x16xf32, #tpu.memory_space<vmem>>, vector<16x16xf32>
    %cst_35 = arith.constant dense<0.000000e+00> : vector<32x16xf32>
    %40 = tpu.matmul %38, %39, %cst_35 {dimension_numbers = #tpu.dot_dimension_numbers<[1], [0], [0], [1], [0, 0, 1, 1], [], []>} : vector<32x16xf32>, vector<16x16xf32>, vector<32x16xf32> -> vector<32x16xf32>
    %c0_36 = arith.constant 0 : index
    %c0_37 = arith.constant 0 : index
    %41 = vector.load %arg22[%c0_36, %c0_37] : memref<1x16xf32, #tpu.memory_space<vmem>>, vector<1x16xf32>
    %42 = vector.broadcast %41 : vector<1x16xf32> to vector<32x16xf32>
    %43 = arith.addf %40, %42 : vector<32x16xf32>
    %c0_38 = arith.constant 0 : index
    %c0_39 = arith.constant 0 : index
    %44 = vector.load %arg8[%c0_38, %c0_39] : memref<16x128xf32, #tpu.memory_space<vmem>>, vector<16x128xf32>
    %cst_40 = arith.constant dense<0.000000e+00> : vector<32x128xf32>
    %45 = tpu.matmul %43, %44, %cst_40 {dimension_numbers = #tpu.dot_dimension_numbers<[1], [0], [0], [1], [0, 0, 1, 1], [], []>} : vector<32x16xf32>, vector<16x128xf32>, vector<32x128xf32> -> vector<32x128xf32>
    %c0_41 = arith.constant 0 : index
    %c0_42 = arith.constant 0 : index
    %46 = vector.load %arg5[%c0_41, %c0_42] : memref<32x128xf32, #tpu.memory_space<vmem>>, vector<32x128xf32>
    %47 = arith.mulf %45, %46 : vector<32x128xf32>
    %cst_43 = arith.constant dense<0.000000e+00> : vector<32x128xf32>
    %48 = tpu.matmul %3, %47, %cst_43 {dimension_numbers = #tpu.dot_dimension_numbers<[1], [0], [0], [1], [0, 0, 1, 1], [], []>} : vector<32x32xf32>, vector<32x128xf32>, vector<32x128xf32> -> vector<32x128xf32>
    %c0_44 = arith.constant 0 : index
    %c0_45 = arith.constant 0 : index
    %49 = vector.load %arg23[%c0_44, %c0_45] : memref<16x128xf32, #tpu.memory_space<vmem>>, vector<16x128xf32>
    %cst_46 = arith.constant dense<0.000000e+00> : vector<32x128xf32>
    %50 = tpu.matmul %38, %49, %cst_46 {dimension_numbers = #tpu.dot_dimension_numbers<[1], [0], [0], [1], [0, 0, 1, 1], [], []>} : vector<32x16xf32>, vector<16x128xf32>, vector<32x128xf32> -> vector<32x128xf32>
    %51 = arith.addf %48, %50 : vector<32x128xf32>
    %c0_47 = arith.constant 0 : index
    %c0_48 = arith.constant 0 : index
    %52 = vector.load %arg24[%c0_47, %c0_48] : memref<1x128xf32, #tpu.memory_space<vmem>>, vector<1x128xf32>
    %53 = vector.broadcast %52 : vector<1x128xf32> to vector<32x128xf32>
    %54 = arith.addf %51, %53 : vector<32x128xf32>
    %cst_49 = arith.constant 2.000000e-01 : f32
    %55 = vector.broadcast %cst_49 : f32 to vector<32x128xf32>
    %56 = arith.mulf %55, %54 : vector<32x128xf32>
    %57 = arith.maximumf %54, %56 : vector<32x128xf32>
    %c0_50 = arith.constant 0 : index
    %c0_51 = arith.constant 0 : index
    %58 = vector.load %arg11[%c0_50, %c0_51] : memref<128x16xf32, #tpu.memory_space<vmem>>, vector<128x16xf32>
    %cst_52 = arith.constant dense<0.000000e+00> : vector<32x16xf32>
    %59 = tpu.matmul %57, %58, %cst_52 {dimension_numbers = #tpu.dot_dimension_numbers<[1], [0], [0], [1], [0, 0, 1, 1], [], []>} : vector<32x128xf32>, vector<128x16xf32>, vector<32x16xf32> -> vector<32x16xf32>
    %60 = arith.addf %59, %2 : vector<32x16xf32>
    %cst_53 = arith.constant dense<0xFF800000> : vector<32xf32>
    %61 = vector.multi_reduction <maximumf>, %60, %cst_53 [1] : vector<32x16xf32> to vector<32xf32>
    %62 = vector.shape_cast %61 : vector<32xf32> to vector<32x1xf32>
    %63 = vector.broadcast %62 : vector<32x1xf32> to vector<32x16xf32>
    %64 = arith.subf %60, %63 : vector<32x16xf32>
    %65 = math.exp %64 : vector<32x16xf32>
    %c0_54 = arith.constant 0 : index
    %c0_55 = arith.constant 0 : index
    %66 = vector.load %arg12[%c0_54, %c0_55] : memref<16x16xf32, #tpu.memory_space<vmem>>, vector<16x16xf32>
    %cst_56 = arith.constant dense<0.000000e+00> : vector<32x16xf32>
    %67 = tpu.matmul %65, %66, %cst_56 {dimension_numbers = #tpu.dot_dimension_numbers<[1], [0], [0], [1], [0, 0, 1, 1], [], []>} : vector<32x16xf32>, vector<16x16xf32>, vector<32x16xf32> -> vector<32x16xf32>
    %68 = arith.divf %65, %67 : vector<32x16xf32>
    %c0_57 = arith.constant 0 : index
    %c0_58 = arith.constant 0 : index
    %69 = vector.load %arg13[%c0_57, %c0_58] : memref<16x128xf32, #tpu.memory_space<vmem>>, vector<16x128xf32>
    %cst_59 = arith.constant dense<0.000000e+00> : vector<32x128xf32>
    %70 = tpu.matmul %68, %69, %cst_59 {dimension_numbers = #tpu.dot_dimension_numbers<[1], [0], [0], [1], [0, 0, 1, 1], [], []>} : vector<32x16xf32>, vector<16x128xf32>, vector<32x128xf32> -> vector<32x128xf32>
    %71 = arith.mulf %70, %48 : vector<32x128xf32>
    %c0_60 = arith.constant 0 : index
    %c0_61 = arith.constant 0 : index
    %72 = vector.load %arg15[%c0_60, %c0_61] : memref<128x8xf32, #tpu.memory_space<vmem>>, vector<128x8xf32>
    %cst_62 = arith.constant dense<0.000000e+00> : vector<32x8xf32>
    %73 = tpu.matmul %71, %72, %cst_62 {dimension_numbers = #tpu.dot_dimension_numbers<[1], [0], [0], [1], [0, 0, 1, 1], [], []>} : vector<32x128xf32>, vector<128x8xf32>, vector<32x8xf32> -> vector<32x8xf32>
    %c0_63 = arith.constant 0 : index
    %c0_64 = arith.constant 0 : index
    %74 = vector.load %arg25[%c0_63, %c0_64] : memref<1x8xf32, #tpu.memory_space<vmem>>, vector<1x8xf32>
    %75 = vector.broadcast %74 : vector<1x8xf32> to vector<32x8xf32>
    %76 = arith.addf %73, %75 : vector<32x8xf32>
    %cst_65 = arith.constant 0.000000e+00 : f32
    %77 = vector.broadcast %cst_65 : f32 to vector<32x8xf32>
    %78 = arith.maximumf %76, %77 : vector<32x8xf32>
    %c0_66 = arith.constant 0 : index
    %c0_67 = arith.constant 0 : index
    %79 = vector.load %arg9[%c0_66, %c0_67] : memref<8x64xf32, #tpu.memory_space<vmem>>, vector<8x64xf32>
    %cst_68 = arith.constant dense<0.000000e+00> : vector<32x64xf32>
    %80 = tpu.matmul %78, %79, %cst_68 {dimension_numbers = #tpu.dot_dimension_numbers<[1], [0], [0], [1], [0, 0, 1, 1], [], []>} : vector<32x8xf32>, vector<8x64xf32>, vector<32x64xf32> -> vector<32x64xf32>
    %c0_69 = arith.constant 0 : index
    %c0_70 = arith.constant 0 : index
    %81 = vector.load %arg6[%c0_69, %c0_70] : memref<32x64xf32, #tpu.memory_space<vmem>>, vector<32x64xf32>
    %82 = arith.mulf %80, %81 : vector<32x64xf32>
    %c0_71 = arith.constant 0 : index
    %c0_72 = arith.constant 0 : index
    %83 = vector.load %arg7[%c0_71, %c0_72] : memref<4x32xf32, #tpu.memory_space<vmem>>, vector<4x32xf32>
    %cst_73 = arith.constant dense<0.000000e+00> : vector<4x64xf32>
    %84 = tpu.matmul %83, %82, %cst_73 {dimension_numbers = #tpu.dot_dimension_numbers<[1], [0], [0], [1], [0, 0, 1, 1], [], []>} : vector<4x32xf32>, vector<32x64xf32>, vector<4x64xf32> -> vector<4x64xf32>
    %c0_74 = arith.constant 0 : index
    %c0_75 = arith.constant 0 : index
    %85 = vector.load %arg26[%c0_74, %c0_75] : memref<64x128xf32, #tpu.memory_space<vmem>>, vector<64x128xf32>
    %cst_76 = arith.constant dense<0.000000e+00> : vector<4x128xf32>
    %86 = tpu.matmul %84, %85, %cst_76 {dimension_numbers = #tpu.dot_dimension_numbers<[1], [0], [0], [1], [0, 0, 1, 1], [], []>} : vector<4x64xf32>, vector<64x128xf32>, vector<4x128xf32> -> vector<4x128xf32>
    %c0_77 = arith.constant 0 : index
    %c0_78 = arith.constant 0 : index
    %87 = vector.load %arg28[%c0_77, %c0_78] : memref<1x128xf32, #tpu.memory_space<vmem>>, vector<1x128xf32>
    %88 = vector.broadcast %87 : vector<1x128xf32> to vector<4x128xf32>
    %89 = arith.addf %86, %88 : vector<4x128xf32>
    %c0_79 = arith.constant 0 : index
    %c0_80 = arith.constant 0 : index
    %90 = vector.load %arg27[%c0_79, %c0_80] : memref<32x128xf32, #tpu.memory_space<vmem>>, vector<32x128xf32>
    %c0_81 = arith.constant 0 : index
    %c0_82 = arith.constant 0 : index
    %91 = vector.load %arg29[%c0_81, %c0_82] : memref<1x128xf32, #tpu.memory_space<vmem>>, vector<1x128xf32>
    %c0_83 = arith.constant 0 : index
    %c0_84 = arith.constant 0 : index
    %92 = vector.load %arg30[%c0_83, %c0_84] : memref<1x128xf32, #tpu.memory_space<vmem>>, vector<1x128xf32>
    %c0_85 = arith.constant 0 : index
    %c0_86 = arith.constant 0 : index
    %93 = vector.load %arg31[%c0_85, %c0_86] : memref<1x128xf32, #tpu.memory_space<vmem>>, vector<1x128xf32>
    %cst_87 = arith.constant 0.000000e+00 : f32
    %94 = vector.broadcast %cst_87 : f32 to vector<1x32xf32>
    %cst_88 = arith.constant 0.000000e+00 : f32
    %95 = vector.broadcast %cst_88 : f32 to vector<1x32xf32>
    %96 = vector.extract_strided_slice %89 {offsets = [0, 0], sizes = [1, 128], strides = [1, 1]} : vector<4x128xf32> to vector<1x128xf32>
    %cst_89 = arith.constant dense<0.000000e+00> : vector<1x128xf32>
    %97 = tpu.matmul %94, %90, %cst_89 {dimension_numbers = #tpu.dot_dimension_numbers<[1], [0], [0], [1], [0, 0, 1, 1], [], []>} : vector<1x32xf32>, vector<32x128xf32>, vector<1x128xf32> -> vector<1x128xf32>
    %98 = arith.addf %96, %97 : vector<1x128xf32>
    %99 = arith.mulf %98, %91 : vector<1x128xf32>
    %100 = math.tanh %99 : vector<1x128xf32>
    %101 = arith.mulf %100, %92 : vector<1x128xf32>
    %102 = arith.addf %101, %93 : vector<1x128xf32>
    %103 = vector.extract_strided_slice %102 {offsets = [0, 0], sizes = [1, 32], strides = [1, 1]} : vector<1x128xf32> to vector<1x32xf32>
    %104 = vector.extract_strided_slice %102 {offsets = [0, 32], sizes = [1, 32], strides = [1, 1]} : vector<1x128xf32> to vector<1x32xf32>
    %105 = vector.extract_strided_slice %102 {offsets = [0, 64], sizes = [1, 32], strides = [1, 1]} : vector<1x128xf32> to vector<1x32xf32>
    %106 = vector.extract_strided_slice %102 {offsets = [0, 96], sizes = [1, 32], strides = [1, 1]} : vector<1x128xf32> to vector<1x32xf32>
    %107 = arith.mulf %104, %95 : vector<1x32xf32>
    %108 = arith.mulf %103, %105 : vector<1x32xf32>
    %109 = arith.addf %107, %108 : vector<1x32xf32>
    %110 = math.tanh %109 : vector<1x32xf32>
    %111 = arith.mulf %106, %110 : vector<1x32xf32>
    %112 = vector.extract_strided_slice %89 {offsets = [1, 0], sizes = [1, 128], strides = [1, 1]} : vector<4x128xf32> to vector<1x128xf32>
    %cst_90 = arith.constant dense<0.000000e+00> : vector<1x128xf32>
    %113 = tpu.matmul %111, %90, %cst_90 {dimension_numbers = #tpu.dot_dimension_numbers<[1], [0], [0], [1], [0, 0, 1, 1], [], []>} : vector<1x32xf32>, vector<32x128xf32>, vector<1x128xf32> -> vector<1x128xf32>
    %114 = arith.addf %112, %113 : vector<1x128xf32>
    %115 = arith.mulf %114, %91 : vector<1x128xf32>
    %116 = math.tanh %115 : vector<1x128xf32>
    %117 = arith.mulf %116, %92 : vector<1x128xf32>
    %118 = arith.addf %117, %93 : vector<1x128xf32>
    %119 = vector.extract_strided_slice %118 {offsets = [0, 0], sizes = [1, 32], strides = [1, 1]} : vector<1x128xf32> to vector<1x32xf32>
    %120 = vector.extract_strided_slice %118 {offsets = [0, 32], sizes = [1, 32], strides = [1, 1]} : vector<1x128xf32> to vector<1x32xf32>
    %121 = vector.extract_strided_slice %118 {offsets = [0, 64], sizes = [1, 32], strides = [1, 1]} : vector<1x128xf32> to vector<1x32xf32>
    %122 = vector.extract_strided_slice %118 {offsets = [0, 96], sizes = [1, 32], strides = [1, 1]} : vector<1x128xf32> to vector<1x32xf32>
    %123 = arith.mulf %120, %109 : vector<1x32xf32>
    %124 = arith.mulf %119, %121 : vector<1x32xf32>
    %125 = arith.addf %123, %124 : vector<1x32xf32>
    %126 = math.tanh %125 : vector<1x32xf32>
    %127 = arith.mulf %122, %126 : vector<1x32xf32>
    %128 = vector.extract_strided_slice %89 {offsets = [2, 0], sizes = [1, 128], strides = [1, 1]} : vector<4x128xf32> to vector<1x128xf32>
    %cst_91 = arith.constant dense<0.000000e+00> : vector<1x128xf32>
    %129 = tpu.matmul %127, %90, %cst_91 {dimension_numbers = #tpu.dot_dimension_numbers<[1], [0], [0], [1], [0, 0, 1, 1], [], []>} : vector<1x32xf32>, vector<32x128xf32>, vector<1x128xf32> -> vector<1x128xf32>
    %130 = arith.addf %128, %129 : vector<1x128xf32>
    %131 = arith.mulf %130, %91 : vector<1x128xf32>
    %132 = math.tanh %131 : vector<1x128xf32>
    %133 = arith.mulf %132, %92 : vector<1x128xf32>
    %134 = arith.addf %133, %93 : vector<1x128xf32>
    %135 = vector.extract_strided_slice %134 {offsets = [0, 0], sizes = [1, 32], strides = [1, 1]} : vector<1x128xf32> to vector<1x32xf32>
    %136 = vector.extract_strided_slice %134 {offsets = [0, 32], sizes = [1, 32], strides = [1, 1]} : vector<1x128xf32> to vector<1x32xf32>
    %137 = vector.extract_strided_slice %134 {offsets = [0, 64], sizes = [1, 32], strides = [1, 1]} : vector<1x128xf32> to vector<1x32xf32>
    %138 = vector.extract_strided_slice %134 {offsets = [0, 96], sizes = [1, 32], strides = [1, 1]} : vector<1x128xf32> to vector<1x32xf32>
    %139 = arith.mulf %136, %125 : vector<1x32xf32>
    %140 = arith.mulf %135, %137 : vector<1x32xf32>
    %141 = arith.addf %139, %140 : vector<1x32xf32>
    %142 = math.tanh %141 : vector<1x32xf32>
    %143 = arith.mulf %138, %142 : vector<1x32xf32>
    %144 = vector.extract_strided_slice %89 {offsets = [3, 0], sizes = [1, 128], strides = [1, 1]} : vector<4x128xf32> to vector<1x128xf32>
    %cst_92 = arith.constant dense<0.000000e+00> : vector<1x128xf32>
    %145 = tpu.matmul %143, %90, %cst_92 {dimension_numbers = #tpu.dot_dimension_numbers<[1], [0], [0], [1], [0, 0, 1, 1], [], []>} : vector<1x32xf32>, vector<32x128xf32>, vector<1x128xf32> -> vector<1x128xf32>
    %146 = arith.addf %144, %145 : vector<1x128xf32>
    %147 = arith.mulf %146, %91 : vector<1x128xf32>
    %148 = math.tanh %147 : vector<1x128xf32>
    %149 = arith.mulf %148, %92 : vector<1x128xf32>
    %150 = arith.addf %149, %93 : vector<1x128xf32>
    %151 = vector.extract_strided_slice %150 {offsets = [0, 0], sizes = [1, 32], strides = [1, 1]} : vector<1x128xf32> to vector<1x32xf32>
    %152 = vector.extract_strided_slice %150 {offsets = [0, 32], sizes = [1, 32], strides = [1, 1]} : vector<1x128xf32> to vector<1x32xf32>
    %153 = vector.extract_strided_slice %150 {offsets = [0, 64], sizes = [1, 32], strides = [1, 1]} : vector<1x128xf32> to vector<1x32xf32>
    %154 = vector.extract_strided_slice %150 {offsets = [0, 96], sizes = [1, 32], strides = [1, 1]} : vector<1x128xf32> to vector<1x32xf32>
    %155 = arith.mulf %152, %141 : vector<1x32xf32>
    %156 = arith.mulf %151, %153 : vector<1x32xf32>
    %157 = arith.addf %155, %156 : vector<1x32xf32>
    %158 = math.tanh %157 : vector<1x32xf32>
    %159 = arith.mulf %154, %158 : vector<1x32xf32>
    %c0_93 = arith.constant 0 : index
    %c0_94 = arith.constant 0 : index
    %160 = vector.load %arg32[%c0_93, %c0_94] : memref<32x3xf32, #tpu.memory_space<vmem>>, vector<32x3xf32>
    %cst_95 = arith.constant dense<0.000000e+00> : vector<1x3xf32>
    %161 = tpu.matmul %159, %160, %cst_95 {dimension_numbers = #tpu.dot_dimension_numbers<[1], [0], [0], [1], [0, 0, 1, 1], [], []>} : vector<1x32xf32>, vector<32x3xf32>, vector<1x3xf32> -> vector<1x3xf32>
    %c0_96 = arith.constant 0 : index
    %c0_97 = arith.constant 0 : index
    %162 = vector.load %arg33[%c0_96, %c0_97] : memref<1x3xf32, #tpu.memory_space<vmem>>, vector<1x3xf32>
    %163 = arith.addf %161, %162 : vector<1x3xf32>
    %164 = vector.shape_cast %163 : vector<1x3xf32> to vector<1x1x3xf32>
    %c0_98 = arith.constant 0 : index
    %c0_99 = arith.constant 0 : index
    %c0_100 = arith.constant 0 : index
    %165 = vector.load %arg34[%c0_98, %c0_99, %c0_100] : memref<1x1x3xf32, #tpu.memory_space<vmem>>, vector<1x1x3xf32>
    tpu.vector_store %arg34[%c0_98, %c0_99, %c0_100], %164 {strides = array<i32>} : memref<1x1x3xf32, #tpu.memory_space<vmem>>, vector<1x1x3xf32>,
    return
  }
  func.func @transform_0(%arg0: i32) -> (i32, i32) {
    %c0_i32 = arith.constant 0 : i32
    %c0_i32_0 = arith.constant 0 : i32
    return %arg0, %c0_i32 : i32, i32
  }
  func.func @transform_1(%arg0: i32) -> (i32, i32) {
    %c0_i32 = arith.constant 0 : i32
    %c0_i32_0 = arith.constant 0 : i32
    return %arg0, %c0_i32 : i32, i32
  }
  func.func @transform_2(%arg0: i32) -> (i32, i32) {
    %c0_i32 = arith.constant 0 : i32
    %c0_i32_0 = arith.constant 0 : i32
    return %arg0, %c0_i32 : i32, i32
  }
  func.func @transform_3(%arg0: i32) -> (i32, i32) {
    %c0_i32 = arith.constant 0 : i32
    %c0_i32_0 = arith.constant 0 : i32
    %c0_i32_1 = arith.constant 0 : i32
    return %c0_i32, %c0_i32_0 : i32, i32
  }
  func.func @transform_4(%arg0: i32) -> (i32, i32) {
    %c0_i32 = arith.constant 0 : i32
    %c0_i32_0 = arith.constant 0 : i32
    %c0_i32_1 = arith.constant 0 : i32
    return %c0_i32, %c0_i32_0 : i32, i32
  }
  func.func @transform_5(%arg0: i32) -> (i32, i32) {
    %c0_i32 = arith.constant 0 : i32
    %c0_i32_0 = arith.constant 0 : i32
    %c0_i32_1 = arith.constant 0 : i32
    return %c0_i32, %c0_i32_0 : i32, i32
  }
  func.func @transform_6(%arg0: i32) -> (i32, i32) {
    %c0_i32 = arith.constant 0 : i32
    %c0_i32_0 = arith.constant 0 : i32
    %c0_i32_1 = arith.constant 0 : i32
    return %c0_i32, %c0_i32_0 : i32, i32
  }
  func.func @transform_7(%arg0: i32) -> (i32, i32) {
    %c0_i32 = arith.constant 0 : i32
    %c0_i32_0 = arith.constant 0 : i32
    %c0_i32_1 = arith.constant 0 : i32
    return %c0_i32, %c0_i32_0 : i32, i32
  }
  func.func @transform_8(%arg0: i32) -> (i32, i32) {
    %c0_i32 = arith.constant 0 : i32
    %c0_i32_0 = arith.constant 0 : i32
    %c0_i32_1 = arith.constant 0 : i32
    return %c0_i32, %c0_i32_0 : i32, i32
  }
  func.func @transform_9(%arg0: i32) -> (i32, i32) {
    %c0_i32 = arith.constant 0 : i32
    %c0_i32_0 = arith.constant 0 : i32
    %c0_i32_1 = arith.constant 0 : i32
    return %c0_i32, %c0_i32_0 : i32, i32
  }
  func.func @transform_10(%arg0: i32) -> (i32, i32) {
    %c0_i32 = arith.constant 0 : i32
    %c0_i32_0 = arith.constant 0 : i32
    %c0_i32_1 = arith.constant 0 : i32
    return %c0_i32, %c0_i32_0 : i32, i32
  }
  func.func @transform_11(%arg0: i32) -> (i32, i32) {
    %c0_i32 = arith.constant 0 : i32
    %c0_i32_0 = arith.constant 0 : i32
    %c0_i32_1 = arith.constant 0 : i32
    return %c0_i32, %c0_i32_0 : i32, i32
  }
  func.func @transform_12(%arg0: i32) -> (i32, i32) {
    %c0_i32 = arith.constant 0 : i32
    %c0_i32_0 = arith.constant 0 : i32
    %c0_i32_1 = arith.constant 0 : i32
    return %c0_i32, %c0_i32_0 : i32, i32
  }
  func.func @transform_13(%arg0: i32) -> (i32, i32) {
    %c0_i32 = arith.constant 0 : i32
    %c0_i32_0 = arith.constant 0 : i32
    %c0_i32_1 = arith.constant 0 : i32
    return %c0_i32, %c0_i32_0 : i32, i32
  }
  func.func @transform_14(%arg0: i32) -> (i32, i32) {
    %c0_i32 = arith.constant 0 : i32
    %c0_i32_0 = arith.constant 0 : i32
    %c0_i32_1 = arith.constant 0 : i32
    return %c0_i32, %c0_i32_0 : i32, i32
  }
  func.func @transform_15(%arg0: i32) -> (i32, i32) {
    %c0_i32 = arith.constant 0 : i32
    %c0_i32_0 = arith.constant 0 : i32
    %c0_i32_1 = arith.constant 0 : i32
    return %c0_i32, %c0_i32_0 : i32, i32
  }
  func.func @transform_16(%arg0: i32) -> (i32, i32) {
    %c0_i32 = arith.constant 0 : i32
    %c0_i32_0 = arith.constant 0 : i32
    %c0_i32_1 = arith.constant 0 : i32
    return %c0_i32, %c0_i32_0 : i32, i32
  }
  func.func @transform_17(%arg0: i32) -> (i32, i32) {
    %c0_i32 = arith.constant 0 : i32
    %c0_i32_0 = arith.constant 0 : i32
    %c0_i32_1 = arith.constant 0 : i32
    return %c0_i32, %c0_i32_0 : i32, i32
  }
  func.func @transform_18(%arg0: i32) -> (i32, i32) {
    %c0_i32 = arith.constant 0 : i32
    %c0_i32_0 = arith.constant 0 : i32
    %c0_i32_1 = arith.constant 0 : i32
    return %c0_i32, %c0_i32_0 : i32, i32
  }
  func.func @transform_19(%arg0: i32) -> (i32, i32) {
    %c0_i32 = arith.constant 0 : i32
    %c0_i32_0 = arith.constant 0 : i32
    %c0_i32_1 = arith.constant 0 : i32
    return %c0_i32, %c0_i32_0 : i32, i32
  }
  func.func @transform_20(%arg0: i32) -> (i32, i32) {
    %c0_i32 = arith.constant 0 : i32
    %c0_i32_0 = arith.constant 0 : i32
    %c0_i32_1 = arith.constant 0 : i32
    return %c0_i32, %c0_i32_0 : i32, i32
  }
  func.func @transform_21(%arg0: i32) -> (i32, i32) {
    %c0_i32 = arith.constant 0 : i32
    %c0_i32_0 = arith.constant 0 : i32
    %c0_i32_1 = arith.constant 0 : i32
    return %c0_i32, %c0_i32_0 : i32, i32
  }
  func.func @transform_22(%arg0: i32) -> (i32, i32) {
    %c0_i32 = arith.constant 0 : i32
    %c0_i32_0 = arith.constant 0 : i32
    %c0_i32_1 = arith.constant 0 : i32
    return %c0_i32, %c0_i32_0 : i32, i32
  }
  func.func @transform_23(%arg0: i32) -> (i32, i32) {
    %c0_i32 = arith.constant 0 : i32
    %c0_i32_0 = arith.constant 0 : i32
    %c0_i32_1 = arith.constant 0 : i32
    return %c0_i32, %c0_i32_0 : i32, i32
  }
  func.func @transform_24(%arg0: i32) -> (i32, i32) {
    %c0_i32 = arith.constant 0 : i32
    %c0_i32_0 = arith.constant 0 : i32
    %c0_i32_1 = arith.constant 0 : i32
    return %c0_i32, %c0_i32_0 : i32, i32
  }
  func.func @transform_25(%arg0: i32) -> (i32, i32) {
    %c0_i32 = arith.constant 0 : i32
    %c0_i32_0 = arith.constant 0 : i32
    %c0_i32_1 = arith.constant 0 : i32
    return %c0_i32, %c0_i32_0 : i32, i32
  }
  func.func @transform_26(%arg0: i32) -> (i32, i32) {
    %c0_i32 = arith.constant 0 : i32
    %c0_i32_0 = arith.constant 0 : i32
    %c0_i32_1 = arith.constant 0 : i32
    return %c0_i32, %c0_i32_0 : i32, i32
  }
  func.func @transform_27(%arg0: i32) -> (i32, i32) {
    %c0_i32 = arith.constant 0 : i32
    %c0_i32_0 = arith.constant 0 : i32
    %c0_i32_1 = arith.constant 0 : i32
    return %c0_i32, %c0_i32_0 : i32, i32
  }
  func.func @transform_28(%arg0: i32) -> (i32, i32) {
    %c0_i32 = arith.constant 0 : i32
    %c0_i32_0 = arith.constant 0 : i32
    %c0_i32_1 = arith.constant 0 : i32
    return %c0_i32, %c0_i32_0 : i32, i32
  }
  func.func @transform_29(%arg0: i32) -> (i32, i32) {
    %c0_i32 = arith.constant 0 : i32
    %c0_i32_0 = arith.constant 0 : i32
    %c0_i32_1 = arith.constant 0 : i32
    return %c0_i32, %c0_i32_0 : i32, i32
  }
  func.func @transform_30(%arg0: i32) -> (i32, i32) {
    %c0_i32 = arith.constant 0 : i32
    %c0_i32_0 = arith.constant 0 : i32
    %c0_i32_1 = arith.constant 0 : i32
    return %c0_i32, %c0_i32_0 : i32, i32
  }
  func.func @transform_31(%arg0: i32) -> (i32, i32) {
    %c0_i32 = arith.constant 0 : i32
    %c0_i32_0 = arith.constant 0 : i32
    %c0_i32_1 = arith.constant 0 : i32
    return %c0_i32, %c0_i32_0 : i32, i32
  }
  func.func @transform_32(%arg0: i32) -> (i32, i32) {
    %c0_i32 = arith.constant 0 : i32
    %c0_i32_0 = arith.constant 0 : i32
    %c0_i32_1 = arith.constant 0 : i32
    return %c0_i32, %c0_i32_0 : i32, i32
  }
  func.func @transform_33(%arg0: i32) -> (i32, i32, i32) {
    %c0_i32 = arith.constant 0 : i32
    %c0_i32_0 = arith.constant 0 : i32
    %c0_i32_1 = arith.constant 0 : i32
    return %arg0, %c0_i32, %c0_i32_0 : i32, i32, i32
  }
}

</mosaic_0001>

<bundles_post_ra>
// kernel: tile.72
= control target key start
LH: loop header
LB: loop body
LE: loop exit
PB: predicated region body
PF: predicated region fallthrough
CT: control target
= control target key end

     0   :  { %vm4_vm0 = vcmask 1047556   ;;  %s209_s14 = smov 96   ;;  %s210_s19 = smov 112   ;;  %vm6_vm1 = vcmask 130048   ;;  %vm25_vm2 = vcmask 1048448   ;;  %vm46_vm3 = vcmask 917248   ;;  %s388_s0 = inlined_call_operand.vmem [shape: f32[16,8,16], index: 0, kind: input, shape index: {}]   ;;  %s389_s1 = inlined_call_operand.vmem [shape: f32[16,128], index: 1, kind: output, shape index: {}]  }
   0x1   :  { %v172_v0 = vld [vmem:[%s388_s0 + $0x6] ss:$8 sm:$0xf]   ;;  %v167_v3 = vld [vmem:[%s388_s0 + $0x7] ss:$8 sm:$0xf]  }
   0x2   :  { %v173_v1 = vld [vmem:[%s388_s0 + $0x6] ss:$8 sm:$0xf0]   ;;  %v168_v4 = vld [vmem:[%s388_s0 + $0x7] ss:$8 sm:$0xf0]  }
   0x3   :  { %v43_v2 = vsel %vm4_vm0, %v173_v1, %v172_v0  ;;  %v22_v5 = vsel %vm4_vm0, %v168_v4, %v167_v3  ;;  %v174_v6 = vld [vmem:[%s388_s0 + $0x46] ss:$8 sm:$0xf]   ;;  %v169_v9 = vld [vmem:[%s388_s0 + $0x47] ss:$8 sm:$0xf]  }
   0x4   :  { %44 = vrot.lane.b32.xlu1 %v43_v2, %s209_s14  ;;  %v175_v7 = vld [vmem:[%s388_s0 + $0x46] ss:$8 sm:$0xf0]   ;;  %23 = vrot.lane.b32.xlu0 %v22_v5, %s210_s19  ;;  %v170_v10 = vld [vmem:[%s388_s0 + $0x47] ss:$8 sm:$0xf0]  }
   0x5   :  { %v53_v8 = vsel %vm4_vm0, %v175_v7, %v174_v6  ;;  %v32_v11 = vsel %vm4_vm0, %v170_v10, %v169_v9  ;;  %v179_v12 = vld [vmem:[%s388_s0 + $0x45] ss:$8 sm:$0xf]   ;;  %v184_v18 = vld [vmem:[%s388_s0 + $0x44] ss:$8 sm:$0xf]  }
   0x6   :  { %v180_v13 = vld [vmem:[%s388_s0 + $0x45] ss:$8 sm:$0xf0]   ;;  %v185_v19 = vld [vmem:[%s388_s0 + $0x44] ss:$8 sm:$0xf0]  }
   0x7   :  { %v177_v14 = vld [vmem:[%s388_s0 + $0x5] ss:$8 sm:$0xf]   ;;  %v74_v16 = vsel %vm4_vm0, %v180_v13, %v179_v12  ;;  %v182_v20 = vld [vmem:[%s388_s0 + $0x4] ss:$8 sm:$0xf]   ;;  %v95_v22 = vsel %vm4_vm0, %v185_v19, %v184_v18 }
   0x8   :  { %54 = vrot.lane.b32.xlu1 %v53_v8, %s209_s14  ;;  %v178_v15 = vld [vmem:[%s388_s0 + $0x5] ss:$8 sm:$0xf0]   ;;  %33 = vrot.lane.b32.xlu0 %v32_v11, %s210_s19  ;;  %v183_v21 = vld [vmem:[%s388_s0 + $0x4] ss:$8 sm:$0xf0]  }
   0x9   :  { %v64_v17 = vsel %vm4_vm0, %v178_v15, %v177_v14  ;;  %s211_s11 = smov 80   ;;  %v85_v23 = vsel %vm4_vm0, %v183_v21, %v182_v20  ;;  %v189_v24 = vld [vmem:[%s388_s0 + $0x43] ss:$8 sm:$0xf]   ;;  %s212_s20 = smov 64   ;;  %vm67_vm4 = vcmask 786048  }
   0xa   :  { %v190_v25 = vld [vmem:[%s388_s0 + $0x43] ss:$8 sm:$0xf0]   ;;  %v194_v28 = vld [vmem:[%s388_s0 + $0x42] ss:$8 sm:$0xf]  }
   0xb   :  { %v187_v26 = vld [vmem:[%s388_s0 + $0x3] ss:$8 sm:$0xf]   ;;  %v195_v29 = vld [vmem:[%s388_s0 + $0x42] ss:$8 sm:$0xf0]   ;;  %v116_v30 = vsel %vm4_vm0, %v190_v25, %v189_v24 }
   0xc   :  { %75 = vrot.lane.b32.xlu1 %v74_v16, %s211_s11  ;;  %65 = vrot.lane.b32.xlu0 %v64_v17, %s211_s11  ;;  %v188_v27 = vld [vmem:[%s388_s0 + $0x3] ss:$8 sm:$0xf0]   ;;  %v192_v31 = vld [vmem:[%s388_s0 + $0x2] ss:$8 sm:$0xf]   ;;  %v137_v40 = vsel %vm4_vm0, %v195_v29, %v194_v28 }
   0xd   :  { %v2_v32 = vld [vmem:[%s388_s0] ss:$8 sm:$0xf]   ;;  %v106_v33 = vsel %vm4_vm0, %v188_v27, %v187_v26  ;;  %v193_v36 = vld [vmem:[%s388_s0 + $0x2] ss:$8 sm:$0xf0]  }
   0xe   :  { %v3_v34 = vld [vmem:[%s388_s0] ss:$8 sm:$0xf0]   ;;  %s213_s8 = smov 48   ;;  %v127_v41 = vsel %vm4_vm0, %v193_v36, %v192_v31  ;;  %s215_s21 = smov 16   ;;  %vm88_vm5 = vcmask 654848  }
   0xf   :  { %v164_v35 = vld [vmem:[%s388_s0 + $0x40] ss:$8 sm:$0xf]   ;;  %v5_v37 = vsel %vm4_vm0, %v3_v34, %v2_v32  ;;  %v199_v42 = vld [vmem:[%s388_s0 + $0x41] ss:$8 sm:$0xf]  }
  0x10   :  { %96 = vrot.lane.b32.xlu1 %v95_v22, %s212_s20  ;;  %86 = vrot.lane.b32.xlu0 %v85_v23, %s212_s20  ;;  %v165_v38 = vld [vmem:[%s388_s0 + $0x40] ss:$8 sm:$0xf0]   ;;  %7 = vst.msk [vmem:[%s389_s1] sm:$0xff] %vm6_vm1, %v5_v37   ;;  %vm109_vm6 = vcmask 523648   ;;  %vm130_vm7 = vcmask 392448  }
  0x11   :  { %v13_v39 = vsel %vm4_vm0, %v165_v38, %v164_v35  ;;  %v200_v43 = vld [vmem:[%s388_s0 + $0x41] ss:$8 sm:$0xf0]   ;;  %vm151_vm8 = vcmask 261248  }
  0x12   :  { %166 = vst.msk [vmem:[%s389_s1 + $0x8] sm:$0xff] %vm6_vm1, %v13_v39   ;;  %v197_v44 = vld [vmem:[%s388_s0 + $0x1] ss:$8 sm:$0xf]   ;;  %v158_v46 = vsel %vm4_vm0, %v200_v43, %v199_v42 }
  0x13   :  { %v198_v45 = vld [vmem:[%s388_s0 + $0x1] ss:$8 sm:$0xf0]   ;;  %s214_s0 = smov 32  }
  0x14   :  { %117 = vrot.lane.b32.xlu1 %v116_v30, %s213_s8  ;;  %107 = vrot.lane.b32.xlu0 %v106_v33, %s213_s8  ;;  %v148_v47 = vsel %vm4_vm0, %v198_v45, %v197_v44 }
  0x18   :  { %138 = vrot.lane.b32.xlu1 %v137_v40, %s214_s0  ;;  %128 = vrot.lane.b32.xlu0 %v127_v41, %s214_s0 }
  0x1c   :  { %159 = vrot.lane.b32.xlu1 %v158_v46, %s215_s21  ;;  %149 = vrot.lane.b32.xlu0 %v148_v47, %s215_s21 }
  0x76   :  { %v45_v48 = vpop.permute.xlu1 %44   ;;  %v24_v49 = vpop.permute.xlu0 %23  }
  0x77   :  { %26 = vst.msk [vmem:[%s389_s1] sm:$0xff] %vm25_vm2, %v24_v49  }
  0x78   :  { %47 = vst.msk [vmem:[%s389_s1] sm:$0xff] %vm46_vm3, %v45_v48  }
  0x7a   :  { %v55_v50 = vpop.permute.xlu1 %54   ;;  %v34_v51 = vpop.permute.xlu0 %33  }
  0x7b   :  { %171 = vst.msk [vmem:[%s389_s1 + $0x8] sm:$0xff] %vm25_vm2, %v34_v51  }
  0x7c   :  { %176 = vst.msk [vmem:[%s389_s1 + $0x8] sm:$0xff] %vm46_vm3, %v55_v50  }
  0x7e   :  { %v76_v52 = vpop.permute.xlu1 %75   ;;  %v66_v53 = vpop.permute.xlu0 %65  }
  0x7f   :  { %181 = vst.msk [vmem:[%s389_s1 + $0x8] sm:$0xff] %vm67_vm4, %v76_v52   ;;  %68 = vst.msk [vmem:[%s389_s1] sm:$0xff] %vm67_vm4, %v66_v53  }
  0x82   :  { %v97_v54 = vpop.permute.xlu1 %96   ;;  %v87_v55 = vpop.permute.xlu0 %86  }
  0x83   :  { %186 = vst.msk [vmem:[%s389_s1 + $0x8] sm:$0xff] %vm88_vm5, %v97_v54   ;;  %89 = vst.msk [vmem:[%s389_s1] sm:$0xff] %vm88_vm5, %v87_v55  }
  0x86   :  { %v118_v56 = vpop.permute.xlu1 %117   ;;  %v108_v57 = vpop.permute.xlu0 %107  }
  0x87   :  { %191 = vst.msk [vmem:[%s389_s1 + $0x8] sm:$0xff] %vm109_vm6, %v118_v56   ;;  %110 = vst.msk [vmem:[%s389_s1] sm:$0xff] %vm109_vm6, %v108_v57  }
  0x8a   :  { %v139_v58 = vpop.permute.xlu1 %138   ;;  %v129_v59 = vpop.permute.xlu0 %128  }
  0x8b   :  { %196 = vst.msk [vmem:[%s389_s1 + $0x8] sm:$0xff] %vm130_vm7, %v139_v58   ;;  %131 = vst.msk [vmem:[%s389_s1] sm:$0xff] %vm130_vm7, %v129_v59  }
  0x8e   :  { %v160_v60 = vpop.permute.xlu1 %159   ;;  %v150_v61 = vpop.permute.xlu0 %149  }
  0x8f   :  { %201 = vst.msk [vmem:[%s389_s1 + $0x8] sm:$0xff] %vm151_vm8, %v160_v60   ;;  %152 = vst.msk [vmem:[%s389_s1] sm:$0xff] %vm151_vm8, %v150_v61  }

// kernel: tile.95
= control target key start
LH: loop header
LB: loop body
LE: loop exit
PB: predicated region body
PF: predicated region fallthrough
CT: control target
= control target key end

     0   :  { %s67_s8 = smov 112   ;;  %s68_s11 = smov 80   ;;  %vm3_vm0 = vcmask 130048   ;;  %vm9_vm1 = vcmask 1048448   ;;  %vm15_vm2 = vcmask 917248   ;;  %vm21_vm3 = vcmask 786048   ;;  %s111_s0 = inlined_call_operand.vmem [shape: f32[4,8,16], index: 0, kind: input, shape index: {}]   ;;  %s112_s1 = inlined_call_operand.vmem [shape: f32[4,128], index: 1, kind: output, shape index: {}]  }
   0x1   :  { %v53_v0 = vld [vmem:[%s111_s0 + $0x7] ss:$8 sm:$0xf]   ;;  %v55_v1 = vld [vmem:[%s111_s0 + $0x5] ss:$8 sm:$0xf]  }
   0x2   :  { %7 = vrot.lane.b32.xlu0 %v53_v0, %s67_s8  ;;  %19 = vrot.lane.b32.xlu1 %v55_v1, %s68_s11  ;;  %v54_v2 = vld [vmem:[%s111_s0 + $0x6] ss:$8 sm:$0xf]   ;;  %v56_v3 = vld [vmem:[%s111_s0 + $0x4] ss:$8 sm:$0xf]  }
   0x3   :  { %s69_s16 = smov 96   ;;  %v2_v4 = vld [vmem:[%s111_s0] ss:$8 sm:$0xf]   ;;  %s70_s19 = smov 64   ;;  %vm27_vm4 = vcmask 654848  }
   0x4   :  { %v57_v5 = vld [vmem:[%s111_s0 + $0x3] ss:$8 sm:$0xf]   ;;  %4 = vst.msk [vmem:[#allocation0] sm:$0xf] %vm3_vm0, %v2_v4   ;;  %s71_s24 = smov 48  }
   0x5   :  { %v58_v6 = vld [vmem:[%s111_s0 + $0x2] ss:$8 sm:$0xf]   ;;  %s72_s25 = smov 32   ;;  %vm33_vm5 = vcmask 523648   ;;  %vm39_vm6 = vcmask 392448  }
   0x6   :  { %13 = vrot.lane.b32.xlu0 %v54_v2, %s69_s16  ;;  %25 = vrot.lane.b32.xlu1 %v56_v3, %s70_s19  ;;  %v59_v7 = vld [vmem:[%s111_s0 + $0x1] ss:$8 sm:$0xf]   ;;  %s73_s0 = smov 16   ;;  %vm45_vm7 = vcmask 261248  }
   0xa   :  { %31 = vrot.lane.b32.xlu0 %v57_v5, %s71_s24  ;;  %37 = vrot.lane.b32.xlu1 %v58_v6, %s72_s25 }
   0xe   :  { %43 = vrot.lane.b32.xlu0 %v59_v7, %s73_s0 }
  0x74   :  { %v8_v8 = vpop.permute.xlu0 %7   ;;  %v20_v9 = vpop.permute.xlu1 %19  }
  0x75   :  { %10 = vst.msk [vmem:[#allocation0] sm:$0xf] %vm9_vm1, %v8_v8  }
  0x78   :  { %v14_v10 = vpop.permute.xlu0 %13   ;;  %v26_v11 = vpop.permute.xlu1 %25  }
  0x79   :  { %16 = vst.msk [vmem:[#allocation0] sm:$0xf] %vm15_vm2, %v14_v10  }
  0x7a   :  { %22 = vst.msk [vmem:[#allocation0] sm:$0xf] %vm21_vm3, %v20_v9  }
  0x7b   :  { %28 = vst.msk [vmem:[#allocation0] sm:$0xf] %vm27_vm4, %v26_v11  }
  0x7c   :  { %v32_v12 = vpop.permute.xlu0 %31   ;;  %v38_v13 = vpop.permute.xlu1 %37  }
  0x7d   :  { %34 = vst.msk [vmem:[#allocation0] sm:$0xf] %vm33_vm5, %v32_v12  }
  0x7e   :  { %40 = vst.msk [vmem:[#allocation0] sm:$0xf] %vm39_vm6, %v38_v13  }
  0x80   :  { %v44_v14 = vpop.permute.xlu0 %43  }
  0x81   :  { %46 = vst.msk [vmem:[#allocation0] sm:$0xf] %vm45_vm7, %v44_v14  }
  0x88   :  { %v50_v15 = vld [vmem:[#allocation0] sm:$0xf] }
  0x89   :  { %52 = vst [vmem:[%s112_s1] sm:$0xf] %v50_v15 }

// kernel: forward.1
= control target key start
LH: loop header
LB: loop body
LE: loop exit
PB: predicated region body
PF: predicated region fallthrough
CT: control target
= control target key end

     0   :  { %s4547_s6 = smov 1   ;;  %s4548_s10 = smov 2   ;;  %s5163_s0 = inlined_call_operand.smem [shape: u32[34], index: -1, kind: input, shape index: {}] }
   0x1   :  { %s4594_s5 = sld [smem:[%s5163_s0]]   ;;  %s4549_s14 = smov 3  }
   0x2   :  { %s4599_s9 = sld [smem:[%s5163_s0 + %s4547_s6]]   ;;  %s4550_s18 = smov 4  }
   0x3   :  { %s4604_s13 = sld [smem:[%s5163_s0 + %s4548_s10]]   ;;  %s4551_s22 = smov 5  }
   0x4   :  { %s4609_s17 = sld [smem:[%s5163_s0 + %s4549_s14]]   ;;  %s4552_s26 = smov 6  }
   0x5   :  { %s4614_s21 = sld [smem:[%s5163_s0 + %s4550_s18]]   ;;  %s4553_s30 = smov 7  }
   0x6   :  { %s4619_s25 = sld [smem:[%s5163_s0 + %s4551_s22]]   ;;  %s4554_s4 = smov 8  }
   0x7   :  { %5179 = sst [smem:[#allocation5_spill]] %s4594_s5  ;;  %s4555_s10 = smov 9  }
   0x8   :  { %5180 = sst [smem:[#allocation6_spill]] %s4599_s9  ;;  %s4556_s15 = smov 10  }
   0x9   :  { %5181 = sst [smem:[#allocation7_spill]] %s4604_s13  ;;  %s4557_s20 = smov 11  }
   0xa   :  { %5182 = sst [smem:[#allocation8_spill]] %s4609_s17  ;;  %s4559_s1 = smov 13  }
   0xb   :  { %5183 = sst [smem:[#allocation9_spill]] %s4614_s21  ;;  %s4560_s7 = smov 14  }
   0xc   :  { %5184 = sst [smem:[#allocation10_spill]] %s4619_s25  ;;  %s4562_s22 = smov 16  }
   0xd   :  { %s4624_s29 = sld [smem:[%s5163_s0 + %s4552_s26]]   ;;  %s4558_s26 = smov 12  }
   0xe   :  { %s4629_s3 = sld [smem:[%s5163_s0 + %s4553_s30]]   ;;  %s4563_s28 = smov 17  }
   0xf   :  { %s4634_s8 = sld [smem:[%s5163_s0 + %s4554_s4]]  }
  0x10   :  { %s4639_s14 = sld [smem:[%s5163_s0 + %s4555_s10]]  }
  0x11   :  { %s4644_s19 = sld [smem:[%s5163_s0 + %s4556_s15]]   ;;  %s4561_s15 = smov 15  }
  0x12   :  { %s4649_s24 = sld [smem:[%s5163_s0 + %s4557_s20]]  }
  0x13   :  { %5185 = sst [smem:[#allocation11_spill]] %s4624_s29 }
  0x14   :  { %5186 = sst [smem:[#allocation12_spill]] %s4629_s3 }
  0x15   :  { %5187 = sst [smem:[#allocation13_spill]] %s4634_s8 }
  0x16   :  { %5188 = sst [smem:[#allocation14_spill]] %s4639_s14 }
  0x17   :  { %5189 = sst [smem:[#allocation15_spill]] %s4644_s19 }
  0x18   :  { %s4654_s30 = sld [smem:[%s5163_s0 + %s4558_s26]]  }
  0x19   :  { %s4659_s6 = sld [smem:[%s5163_s0 + %s4559_s1]]  }
  0x1a   :  { %s4664_s12 = sld [smem:[%s5163_s0 + %s4560_s7]]   ;;  %s4564_s7 = smov 18  }
  0x1b   :  { %s4669_s20 = sld [smem:[%s5163_s0 + %s4561_s15]]   ;;  %s4565_s15 = smov 19  }
  0x1c   :  { %s4674_s27 = sld [smem:[%s5163_s0 + %s4562_s22]]   ;;  %s4566_s22 = smov 20  }
  0x1d   :  { %s4679_s4 = sld [smem:[%s5163_s0 + %s4563_s28]]   ;;  %s4567_s28 = smov 21  }
  0x1e   :  { %s4684_s29 = sld [smem:[%s5163_s0 + %s4564_s7]]   ;;  %s4568_s7 = smov 22  }
  0x1f   :  { %5190 = sst [smem:[#allocation16_spill]] %s4659_s6 }
  0x20   :  { %5191 = sst [smem:[#allocation17_spill]] %s4664_s12 }
  0x21   :  { %s4689_s25 = sld [smem:[%s5163_s0 + %s4565_s15]]   ;;  %s4569_s15 = smov 23  }
  0x22   :  { %s4694_s8 = sld [smem:[%s5163_s0 + %s4566_s22]]   ;;  %s4570_s22 = smov 24  }
  0x23   :  { %5192 = sst [smem:[#allocation18_spill]] %s4679_s4 }
  0x24   :  { %s4699_s12 = sld [smem:[%s5163_s0 + %s4567_s28]]   ;;  %s4571_s28 = smov 25  }
  0x25   :  { %s4704_s19 = sld [smem:[%s5163_s0 + %s4568_s7]]   ;;  %s4572_s7 = smov 26  }
  0x26   :  { %s4709_s21 = sld [smem:[%s5163_s0 + %s4569_s15]]   ;;  %s4573_s15 = smov 27  }
  0x27   :  { %5193 = sst [smem:[#allocation19_spill]] %s4689_s25 }
  0x28   :  { %5194 = sst [smem:[#allocation20_spill]] %s4694_s8 }
  0x29   :  { %s4714_s17 = sld [smem:[%s5163_s0 + %s4570_s22]]   ;;  %s4574_s22 = smov 28  }
  0x2a   :  { %5195 = sst [smem:[#allocation21_spill]] %s4699_s12 }
  0x2b   :  { %s4719_s12 = sld [smem:[%s5163_s0 + %s4571_s28]]   ;;  %s4575_s28 = smov 29  }
  0x2c   :  { %5196 = sst [smem:[#allocation22_spill]] %s4709_s21 }
  0x2d   :  { %s4724_s25 = sld [smem:[%s5163_s0 + %s4572_s7]]   ;;  %s4576_s7 = smov 30  }
  0x2e   :  { %s4729_s21 = sld [smem:[%s5163_s0 + %s4573_s15]]   ;;  %s4577_s15 = smov 31  }
  0x2f   :  { %5197 = sst [smem:[#allocation23_spill]] %s4714_s17 }
  0x30   :  { %s4734_s17 = sld [smem:[%s5163_s0 + %s4574_s22]]   ;;  %s4578_s22 = smov 32  }
  0x31   :  { %5198 = sst [smem:[#allocation24_spill]] %s4719_s12 }
  0x32   :  { %s4739_s12 = sld [smem:[%s5163_s0 + %s4575_s28]]   ;;  %s4579_s28 = smov 33  }
  0x33   :  { %5199 = sst [smem:[#allocation25_spill]] %s4724_s25 }
  0x34   :  { %5200 = sst [smem:[#allocation26_spill]] %s4729_s21 }
  0x35   :  { %s4744_s25 = sld [smem:[%s5163_s0 + %s4576_s7]]  }
  0x36   :  { %5201 = sst [smem:[#allocation27_spill]] %s4734_s17 }
  0x37   :  { %s4749_s21 = sld [smem:[%s5163_s0 + %s4577_s15]]  }
  0x38   :  { %5202 = sst [smem:[#allocation28_spill]] %s4739_s12 }
  0x39   :  { %s4754_s17 = sld [smem:[%s5163_s0 + %s4578_s22]]  }
  0x3a   :  { %s4759_s12 = sld [smem:[%s5163_s0 + %s4579_s28]]  }
  0x3b   :  { %72 = vsyncpa [#allocation3], 0 }
  0x3c   :  { %74 = vsyncpa [#allocation3 + $0x1], 0  ;;  %s4761_s7 = smov 0   ;;  %s4763_s10 = smov 0  }
  0x3d   :  { %s4765_s11 = smov 0   ;;  %s4767_s15 = smov 0  }
  0x3e LB: > { %s5203_s14 = sld [smem:[#allocation14_spill]]  ;;  %s5204_s8 = sld [smem:[#allocation20_spill]]  ;;  %s4545_s15 = sphi %s4767_s15, %s5232_s15   ;;  %s4541_s11 = sphi %s4765_s11, %s5231_s11   ;;  %s4537_s10 = sphi %s4763_s10, %s5230_s10   ;;  %s4533_s7 = sphi %s4761_s7, %s5229_s7  }
  0x3f   : > { %s5205_s6 = sld [smem:[#allocation16_spill]]  ;;  %s5206_s3 = sld [smem:[#allocation12_spill]] }
  0x40   : > { %s4782_s0 = sadd.s32 4294967295, %s4545_s15   ;;  %s3529_s16 = sadd.s32 4294967294, %s4545_s15  }
  0x41   : > { %s4786_s18 = sadd.s32 1, %s4545_s15   ;;  %s795_s22 = sadd.s32 1, %s4541_s11 }
  0x42   : > { %s792_s23 = ssub.s32 %s4545_s15, %s4786_s18  ;;  %p805_p0 = scmp.ne.s32.totalorder %s4541_s11, %s4537_s10 }
  0x43   : > { %p793_p1 = scmp.eq.s32.totalorder %s792_s23, 0  ;;  %p806_p2 = scmp.eq.s32.totalorder %s4782_s0, 1 }
  0x44   : > { %p811_p3 = scmp.ne.s32.totalorder %s4537_s10, %s4533_s7  ;;  %p812_p4 = scmp.eq.s32.totalorder %s3529_s16, 1 }
  0x45   : > { %s4797_s26 = scalar_select %p793_p1, %s4541_s11, %s795_s22  }
  0x46   : > { %p4799_p5 = por %p806_p2, %p805_p0  ;;  %p4803_p6 = por %p812_p4, %p811_p3 }
  0x47   : > { %p3532_p7 = scmp.ge.s32.totalorder %s4545_s15, 1  ;;  %p947_p8 = scmp.lt.s32.totalorder %s4545_s15, 3 }
  0x49   : > { %p948_p9 = pnand %p3532_p7, %p947_p8 }
  0x4a   : > { %s5209_s4 = sld [smem:[#allocation18_spill]] (!%p948_p9)  ;;  %v1074_v0 = vld [vmem:[%s4669_s20] sm:$0xff] (!%p948_p9)  ;;  %v1075_v1 = vld [vmem:[%s4669_s20 + $0x8] sm:$0xff] (!%p948_p9)  ;;  %v1076_v2 = vld [vmem:[%s4669_s20 + $0x10] sm:$0xff] (!%p948_p9)  ;;  %s3533_s2 = sshll.u32 (!%p948_p9), %s4782_s0, 2  ;;  %vm1197_vm0 = vcmask (!%p948_p9), 1043456  }
  0x4b   : > { %951 = sbr.rel (%p948_p9) target bundleno = 6557 (0x199d), region = 152  ;;  %v4138_v3 = vpack.c.bf16 (!%p948_p9), %v1075_v1, %v1074_v0  ;;  %v1077_v4 = vld [vmem:[%s4669_s20 + $0x18] sm:$0xff] (!%p948_p9)  ;;  %s5210_s9 = sld [smem:[#allocation6_spill]] (!%p948_p9)  ;;  %v1309_v6 = vld [vmem:[%s5203_s14] sm:$0xff] (!%p948_p9)  ;;  %v1310_v8 = vld [vmem:[%s5203_s14 + $0x8] sm:$0xff] (!%p948_p9)  ;;  %vm1085_vm1 = vcmask (!%p948_p9), 261120  }
  0x4c   : > { %p1041_p10 = scmp.lt.s32.totalorder (!%p948_p9), %s3533_s2, 7  ;;  %s5211_s5 = sld [smem:[#allocation5_spill]] (!%p948_p9)  ;;  %v4142_v7 = vpack.c.bf16 (!%p948_p9), %v1077_v4, %v1076_v2  ;;  %v4146_v9 = vpack.c.bf16 (!%p948_p9), %v1310_v8, %v1309_v6  ;;  %vm1184_vm2 = vcmask (!%p948_p9), 31744   ;;  %v1311_v10 = vld [vmem:[%s5203_s14 + $0x10] sm:$0xff] (!%p948_p9)  ;;  %v1312_v11 = vld [vmem:[%s5203_s14 + $0x18] sm:$0xff] (!%p948_p9)  ;;  %v1313_v19 = vld [vmem:[%s5203_s14 + $0x20] sm:$0xff] (!%p948_p9) }
  0x4d   : > { %4139 = vmatprep.subr.bf16.mxu0 (!%p948_p9), %v4138_v3  ;;  %v4150_v18 = vpack.c.bf16 (!%p948_p9), %v1312_v11, %v1311_v10  ;;  %v1314_v20 = vld [vmem:[%s5203_s14 + $0x28] sm:$0xff] (!%p948_p9)  ;;  %v1315_v24 = vld [vmem:[%s5203_s14 + $0x30] sm:$0xff] (!%p948_p9)  ;;  %v1316_v25 = vld [vmem:[%s5203_s14 + $0x38] sm:$0xff] (!%p948_p9)  ;;  %s5212_s13 = sld [smem:[#allocation7_spill]] (!%p948_p9)  ;;  %vm1410_vm3 = vcmask (!%p948_p9), 130048   ;;  %vm2621_vm4 = vcmask (!%p948_p9), 64512  }
  0x4e   : > { %4141 = vmatpush3.bf16.msra.mxu0 (!%p948_p9), %v4138_v3  ;;  %v4154_v23 = vpack.c.bf16 (!%p948_p9), %v1314_v20, %v1313_v19  ;;  %v4158_v26 = vpack.c.bf16 (!%p948_p9), %v1316_v25, %v1315_v24  ;;  %v1317_v27 = vld [vmem:[%s5203_s14 + $0x40] sm:$0xff] (!%p948_p9)  ;;  %v1318_v28 = vld [vmem:[%s5203_s14 + $0x48] sm:$0xff] (!%p948_p9)  ;;  %v1319_v30 = vld [vmem:[%s5203_s14 + $0x50] sm:$0xff] (!%p948_p9)  ;;  %vm4581_vm5 = vmmov (!%p948_p9), 0   ;;  %vm2816_vm6 = vcmask (!%p948_p9), 523264  }
  0x4f   : > { %4143 = vmatprep.subr.bf16.mxu0 (!%p948_p9), %v4142_v7  ;;  %v4162_v29 = vpack.c.bf16 (!%p948_p9), %v1318_v28, %v1317_v27  ;;  %v1320_v31 = vld [vmem:[%s5203_s14 + $0x58] sm:$0xff] (!%p948_p9)  ;;  %v1321_v33 = vld [vmem:[%s5203_s14 + $0x60] sm:$0xff] (!%p948_p9)  ;;  %v1322_v34 = vld [vmem:[%s5203_s14 + $0x68] sm:$0xff] (!%p948_p9)  ;;  %vm3402_vm7 = vcmask (!%p948_p9), 16384  }
  0x50   : > { %v1183_v5 = vld [vmem:[%s5209_s4] sm:$0xf] (!%p948_p9)  ;;  %v4166_v32 = vpack.c.bf16 (!%p948_p9), %v1320_v31, %v1319_v30  ;;  %v4170_v35 = vpack.c.bf16 (!%p948_p9), %v1322_v34, %v1321_v33  ;;  %v1323_v36 = vld [vmem:[%s5203_s14 + $0x70] sm:$0xff] (!%p948_p9)  ;;  %v1324_v37 = vld [vmem:[%s5203_s14 + $0x78] sm:$0xff] (!%p948_p9)  ;;  %s5223_s4 = sld [smem:[#allocation10_spill]] (!%p948_p9) }
  0x51   : > { %3801 = vmatprep.subr.msk.mxu1 (!%p948_p9), %vm1197_vm0, %v1183_v5  ;;  %v4174_v38 = vpack.c.bf16 (!%p948_p9), %v1324_v37, %v1323_v36  ;;  %v3539_v39 = vld [vmem:[%s4674_s27] ss:$0 sm:$0xff] (!%p948_p9) }
  0x52   : > { %s5234_s2 = smov (!%p1041_p10, %s3533_s2), 7  ;;  %3802 = vmatpush3.msk.msra.mxu1 %vm1197_vm0, %v1183_v5  ;;  %4145 = vmatpush3.bf16.msra.mxu0 %v4142_v7  ;;  %v3549_v46 = vld [vmem:[%s4684_s29] ss:$0 sm:$0xff] }
  0x53   : > { %s4817_s16 = sshll.u32 %s5234_s2, 3  ;;  %4147 = vmatprep.subr.bf16.mxu1 %v4146_v9 }
  0x54   : > { %s1050_s22 = scalar_lea.vmem %s5210_s9, %s4817_s16  ;;  %s1044_s23 = scalar_lea.vmem %s5211_s5, %s4817_s16 }
  0x55   : > { %v1062_v12 = vld [vmem:[%s1050_s22] sm:$0xff]  ;;  %v1063_v14 = vld [vmem:[%s1050_s22 + $0x8] sm:$0xff]  ;;  %v1064_v16 = vld [vmem:[%s1050_s22 + $0x10] sm:$0xff]  ;;  %s1056_s2 = scalar_lea.vmem %s5212_s13, %s4817_s16  ;;  %s5213_s16 = sld [smem:[#allocation19_spill]] }
  0x56   : > { %v1058_v13 = vld [vmem:[%s1044_s23] sm:$0xff]  ;;  %3795 = vmatprep.mubr.msk.f32.mxu0 %vm1085_vm1, %v1062_v12  ;;  %v1059_v15 = vld [vmem:[%s1044_s23 + $0x8] sm:$0xff]  ;;  %v1060_v17 = vld [vmem:[%s1044_s23 + $0x10] sm:$0xff]  ;;  %s5225_s5 = sld [smem:[#allocation11_spill]] }
  0x57   : > { %3803 = vmatprep.mubr.msk.f32.mxu1 %vm1184_vm2, %v1058_v13  ;;  %3796 = vmatmul.mubr.msk.f32.vlgmr.msra.gmra.mrb[0].mxu0 %vm1085_vm1, %v1063_v14  ;;  %v1061_v21 = vld [vmem:[%s1044_s23 + $0x18] sm:$0xff]  ;;  %v4861_v5 = vld [vmem:[%s1056_s2] sm:$0xff]  ;;  %v4863_v7 = vld [vmem:[%s1056_s2 + $0x8] sm:$0xff]  ;;  %s5215_s23 = sld [smem:[#allocation8_spill]] }
  0x58   : > { %3804 = vmatmul.mubr.msk.f32.vlgmr.msra.gmra.mrb[0].mxu1 %vm1184_vm2, %v1059_v15  ;;  %3798 = vmatprep.mubr.msk.f32.mxu0 %vm1085_vm1, %v1064_v16  ;;  %v1065_v22 = vld [vmem:[%s1050_s22 + $0x18] sm:$0xff]  ;;  %v4866_v10 = vld [vmem:[%s1056_s2 + $0x10] sm:$0xff]  ;;  %s5214_s22 = sld [smem:[#allocation21_spill]] }
  0x59   : > { %3806 = vmatprep.mubr.msk.f32.mxu1 %vm1184_vm2, %v1060_v17  ;;  %4149 = vmatpush3.bf16.msra.mxu1 %v4146_v9  ;;  %v4870_v14 = vld [vmem:[%s1056_s2 + $0x18] sm:$0xff]  ;;  %s5216_s2 = sld [smem:[#allocation9_spill]] }
  0x5a   : > { %4151 = vmatprep.subr.bf16.mxu1 %v4150_v18 }
  0x5b   : > { %3799 = vmatmul.mubr.msk.f32.gmra.mrb[2].mxu0 %vm1085_vm1, %v1065_v22  ;;  %v1436_v22 = vld [vmem:[%s4649_s24 + $0x8] sm:$0xff] }
  0x5c   : > { %3807 = vmatmul.mubr.msk.f32.gmra.mrb[2].mxu1 %vm1184_vm2, %v1061_v21  ;;  %v1435_v21 = vld [vmem:[%s4649_s24] sm:$0xff] }
  0x5d   : > { %4153 = vmatpush3.bf16.msra.mxu1 %v4150_v18 }
  0x5e   : > { %4155 = vmatprep.subr.bf16.mxu1 %v4154_v23 }
  0x61   : > { %4157 = vmatpush3.bf16.msra.mxu1 %v4154_v23  ;;  %v4879_v23 = vpack.c.bf16 %v1436_v22, %v1435_v21  ;;  %v1660_v21 = vld [vmem:[%s5205_s6 + $0x78] sm:$0xff] }
  0x62   : > { %4159 = vmatprep.subr.bf16.mxu1 %v4158_v26 }
  0x63   : > { %4179 = vmatprep.subr.bf16.mxu0 %v4879_v23 }
  0x64   : > { %4181 = vmatpush3.bf16.msra.mxu0 %v4879_v23 }
  0x65   : > { %4161 = vmatpush3.bf16.msra.mxu1 %v4158_v26 }
  0x66   : > { %4163 = vmatprep.subr.bf16.mxu1 %v4162_v29 }
  0x69   : > { %4165 = vmatpush3.bf16.msra.mxu1 %v4162_v29 }
  0x6a   : > { %4167 = vmatprep.subr.bf16.mxu1 %v4166_v32 }
  0x6d   : > { %4169 = vmatpush3.bf16.msra.mxu1 %v4166_v32 }
  0x6e   : > { %4171 = vmatprep.subr.bf16.mxu1 %v4170_v35 }
  0x71   : > { %4173 = vmatpush3.bf16.msra.mxu1 %v4170_v35 }
  0x72   : > { %4175 = vmatprep.subr.bf16.mxu1 %v4174_v38 }
  0x75   : > { %4177 = vmatpush3.bf16.msra.mxu1 %v4174_v38 }
 0x12a   : > { %v3797_v41 = vpop.f32.mrb[0].mxu0 }
 0x12b   : > { %v3805_v40 = vpop.f32.mrb[0].mxu1  ;;  %v4846_v43 = vadd.f32 %v3797_v41, %v3539_v39  ;;  %v1164_v44 = vpop.f32.mrb[1].mxu0  ;;  %v1543_v41 = vld [vmem:[%s4654_s30 + $0x8] sm:$0xff] }
 0x12c   : > { %v1267_v42 = vpop.f32.mrb[1].mxu1  ;;  %v4848_v45 = vadd.f32 %v3539_v39, %v1164_v44  ;;  %v1645_v44 = vld [vmem:[%s5205_s6] sm:$0xff] }
 0x12d   : > { %v1287_v47 = vadd.f32 %v3805_v40, %v4846_v43  ;;  %v1542_v40 = vld [vmem:[%s4654_s30] sm:$0xff] }
 0x12e   : > { %v1286_v49 = vadd.f32 %v1267_v42, %v4848_v45  ;;  %v3800_v50 = vpop.f32.mrb[2].mxu0  ;;  %v4889_v42 = vpack.c.bf16 %v1543_v41, %v1542_v40 }
 0x12f   : > { %v3808_v48 = vpop.f32.mrb[2].mxu1  ;;  %v1298_v52 = vadd.f32 %v3549_v46, %v1287_v47  ;;  %v4853_v53 = vadd.f32 %v3800_v50, %v3539_v39  ;;  %v1174_v54 = vpop.f32.mrb[3].mxu0 }
 0x130   : > { %v1277_v51 = vpop.f32.mrb[3].mxu1  ;;  %v1297_v55 = vadd.f32 %v3549_v46, %v1286_v49  ;;  %v4855_v56 = vadd.f32 %v3539_v39, %v1174_v54  ;;  %4183 = vmatprep.subr.bf16.mxu0 %v4889_v42  ;;  %v1647_v54 = vld [vmem:[%s5205_s6 + $0x10] sm:$0xff] }
 0x131   : > { %v1302_v57 = vmul.f32 0.2, %v1298_v52  ;;  %v1289_v58 = vadd.f32 %v3808_v48, %v4853_v53 }
 0x132   : > { %v1301_v59 = vmul.f32 0.2, %v1297_v55  ;;  %v1288_v60 = vadd.f32 %v1277_v51, %v4855_v56 }
 0x133   : > { %v1300_v61 = vadd.f32 %v3549_v46, %v1289_v58  ;;  %v1306_v0 = vmax.f32 %v1298_v52, %v1302_v57 }
 0x134   : > { %v1299_v62 = vadd.f32 %v3549_v46, %v1288_v60  ;;  %v1305_v63 = vmax.f32 %v1297_v55, %v1301_v59  ;;  %v1646_v46 = vld [vmem:[%s5205_s6 + $0x8] sm:$0xff]  ;;  %v1648_v55 = vld [vmem:[%s5205_s6 + $0x18] sm:$0xff] }
 0x135   : > { %v1304_v1 = vmul.f32 0.2, %v1300_v61  ;;  %v4186_v47 = vpack.c.bf16 %v1646_v46, %v1645_v44  ;;  %v4190_v60 = vpack.c.bf16 %v1648_v55, %v1647_v54  ;;  %v3559_v54 = vld [vmem:[%s5214_s22] ss:$0 sm:$0xff]  ;;  %s5218_s22 = sld [smem:[#allocation22_spill]] }
 0x136   : > { %v1303_v2 = vmul.f32 0.2, %v1299_v62  ;;  %3841 = vmatprep.mubr.f32.mxu1 %v1305_v63  ;;  %v1650_v63 = vld [vmem:[%s5205_s6 + $0x28] sm:$0xff] }
 0x137   : > { %3842 = vmatmul.mubr.f32.vlgmr.msra.gmra.mrb[4].mxu1 %v1306_v0  ;;  %v1308_v4 = vmax.f32 %v1300_v61, %v1304_v1 }
 0x138   : > { %v1307_v3 = vmax.f32 %v1299_v62, %v1303_v2  ;;  %v1649_v62 = vld [vmem:[%s5205_s6 + $0x20] sm:$0xff] }
 0x13a   : > { %3844 = vmatprep.mubr.f32.mxu1 %v1307_v3  ;;  %v4194_v3 = vpack.c.bf16 %v1650_v63, %v1649_v62 }
 0x13b   : > { %3845 = vmatmul.mubr.f32.gmra.mrb[6].mxu1 %v1308_v4  ;;  %v1651_v4 = vld [vmem:[%s5205_s6 + $0x30] sm:$0xff] }
 0x20a   : > { %v3843_v6 = vpop.f32.mrb[4].mxu1 }
 0x20b   : > { %v1391_v8 = vpop.f32.mrb[5].mxu1  ;;  %v1397_v11 = vadd.f32 %v3843_v6, %v4863_v7  ;;  %v1652_v6 = vld [vmem:[%s5205_s6 + $0x38] sm:$0xff] }
 0x20c   : > { %v1392_v9 = vadd.f32 %v1391_v8, %v4861_v5  ;;  %v4198_v8 = vpack.c.bf16 %v1652_v6, %v1651_v4  ;;  %v1963_v4 = vld [vmem:[%s5216_s2 + $0x8] sm:$0xff]  ;;  %v1962_v6 = vld [vmem:[%s5216_s2] sm:$0xff] }
 0x20d   : > { %v1414_v18 = vsel %vm1410_vm3, %v1397_v11, -inf }
 0x20e   : > { %v3846_v12 = vpop.f32.mrb[6].mxu1  ;;  %v1411_v13 = vsel %vm1410_vm3, %v1392_v9, -inf }
 0x20f   : > { %1412 = vmax.xlane.f32.xlu0 %v1411_v13  ;;  %v1401_v15 = vpop.f32.mrb[7].mxu1  ;;  %v1407_v17 = vadd.f32 %v3846_v12, %v4870_v14  ;;  %v1655_v13 = vld [vmem:[%s5205_s6 + $0x50] sm:$0xff] }
 0x210   : > { %v1402_v16 = vadd.f32 %v1401_v15, %v4866_v10  ;;  %v1656_v15 = vld [vmem:[%s5205_s6 + $0x58] sm:$0xff] }
 0x211   : > { %v1420_v20 = vsel %vm1410_vm3, %v1407_v17, -inf }
 0x212   : > { %v1417_v19 = vsel %vm1410_vm3, %v1402_v16, -inf }
 0x213   : > { %1415 = vmax.xlane.f32.xlu0 %v1414_v18  ;;  %1418 = vmax.xlane.f32.xlu1 %v1417_v19  ;;  %v1658_v18 = vld [vmem:[%s5205_s6 + $0x68] sm:$0xff] }
 0x217   : > { %1421 = vmax.xlane.f32.xlu1 %v1420_v20  ;;  %v1659_v20 = vld [vmem:[%s5205_s6 + $0x70] sm:$0xff] }
 0x218   : > { %v4214_v22 = vpack.c.bf16 %v1660_v21, %v1659_v20 }
 0x29c   : > { %v1413_v24 = vpop.xlane.xlu0 %1412 }
 0x29d   : > { %v1423_v25 = vsub.f32 %v1392_v9, %v1413_v24  ;;  %v1653_v9 = vld [vmem:[%s5205_s6 + $0x40] sm:$0xff] }
 0x29e   : > { %v1757_v24 = vld [vmem:[%s5204_s8] sm:$0xff] }
 0x29f   : > { %v1427_v26 = vmul.f32 1.442695, %v1423_v25  ;;  %v1758_v25 = vld [vmem:[%s5204_s8 + $0x8] sm:$0xff] }
 0x2a0   : > { %v1416_v27 = vpop.xlane.xlu0 %1415  ;;  %v1419_v28 = vpop.xlane.xlu1 %1418 }
 0x2a1   : > { %4435 = vpow2.f32 %v1427_v26  ;;  %v1424_v29 = vsub.f32 %v1397_v11, %v1416_v27  ;;  %v1425_v30 = vsub.f32 %v1402_v16, %v1419_v28  ;;  %v1654_v11 = vld [vmem:[%s5205_s6 + $0x48] sm:$0xff]  ;;  %v4206_v16 = vpack.c.bf16 %v1656_v15, %v1655_v13  ;;  %v1965_v13 = vld [vmem:[%s5216_s2 + $0x18] sm:$0xff]  ;;  %v1964_v15 = vld [vmem:[%s5216_s2 + $0x10] sm:$0xff]  ;;  %s5220_s2 = sld [smem:[#allocation13_spill]] }
 0x2a2   : > { %v4202_v12 = vpack.c.bf16 %v1654_v11, %v1653_v9  ;;  %v4218_v26 = vpack.c.bf16 %v1758_v25, %v1757_v24 }
 0x2a3   : > { %v1429_v31 = vmul.f32 1.442695, %v1424_v29  ;;  %v1431_v32 = vmul.f32 1.442695, %v1425_v30 }
 0x2a4   : > { %v1422_v33 = vpop.xlane.xlu1 %1421  ;;  %4219 = vmatprep.subr.bf16.mxu1 %v4218_v26 }
 0x2a5   : > { %4437 = vpow2.f32 %v1429_v31  ;;  %v1426_v34 = vsub.f32 %v1407_v17, %v1422_v33  ;;  %v1657_v17 = vld [vmem:[%s5205_s6 + $0x60] sm:$0xff]  ;;  %4221 = vmatpush3.bf16.msra.mxu1 %v4218_v26 }
 0x2a6   : > { %4439 = vpow2.f32 %v1431_v32  ;;  %v4210_v19 = vpack.c.bf16 %v1658_v18, %v1657_v17 }
 0x2a7   : > { %v1433_v35 = vmul.f32 1.442695, %v1426_v34 }
 0x2a9   : > { %4441 = vpow2.f32 %v1433_v35  ;;  %v2067_v35 = vld [vmem:[%s4704_s19] sm:$0xff] }
 0x2ab   : > { %v4436_v36 = vpop.eup %4435 }
 0x2ac   : > { %3851 = vmatprep.mubr.msk.f32.mxu0 %vm1410_vm3, %v4436_v36 }
 0x2af   : > { %v4438_v37 = vpop.eup %4437 }
 0x2b0   : > { %v4440_v38 = vpop.eup %4439  ;;  %3852 = vmatmul.mubr.msk.f32.vlgmr.msra.gmra.mrb[4].mxu0 %vm1410_vm3, %v4438_v37 }
 0x2b1   : > { %3854 = vmatprep.mubr.msk.f32.mxu0 %vm1410_vm3, %v4440_v38  ;;  %4185 = vmatpush3.bf16.msra.mxu0 %v4889_v42 }
 0x2b2   : > { %4187 = vmatprep.subr.bf16.mxu0 %v4186_v47 }
 0x2b3   : > { %v4442_v39 = vpop.eup %4441 }
 0x2b4   : > { %3855 = vmatmul.mubr.msk.f32.gmra.mrb[6].mxu0 %vm1410_vm3, %v4442_v39 }
 0x383   : > { %v3853_v48 = vpop.f32.mrb[4].mxu0 }
 0x384   : > { %4443 = vrcp.f32 %v3853_v48  ;;  %v1515_v49 = vpop.f32.mrb[5].mxu0 }
 0x385   : > { %4445 = vrcp.f32 %v1515_v49 }
 0x387   : > { %v3856_v50 = vpop.f32.mrb[6].mxu0 }
 0x388   : > { %4447 = vrcp.f32 %v3856_v50  ;;  %v1525_v51 = vpop.f32.mrb[7].mxu0 }
 0x389   : > { %4449 = vrcp.f32 %v1525_v51 }
 0x38e   : > { %v4444_v52 = vpop.eup %4443 }
 0x38f   : > { %v4446_v57 = vpop.eup %4445  ;;  %v1537_v59 = vmul.f32 %v4444_v52, %v4438_v37 }
 0x390   : > { %v1535_v58 = vmul.f32 %v4446_v57, %v4436_v36  ;;  %v2068_v36 = vld [vmem:[%s4704_s19 + $0x8] sm:$0xff] }
 0x391   : > { %v4234_v37 = vpack.c.bf16 %v2068_v36, %v2067_v35 }
 0x392   : > { %v4448_v61 = vpop.eup %4447  ;;  %3861 = vmatprep.mubr.msk.f32.mxu0 %vm1410_vm3, %v1535_v58 }
 0x393   : > { %v4450_v0 = vpop.eup %4449  ;;  %3862 = vmatmul.mubr.msk.f32.vlgmr.msra.gmra.mrb[8].mxu0 %vm1410_vm3, %v1537_v59  ;;  %v1541_v2 = vmul.f32 %v4448_v61, %v4442_v39  ;;  %v3558_v39 = vld [vmem:[%s5213_s16] ss:$0 sm:$0xff]  ;;  %s5217_s16 = sld [smem:[#allocation15_spill]] }
 0x394   : > { %v1539_v1 = vmul.f32 %v4450_v0, %v4440_v38  ;;  %4189 = vmatpush3.bf16.msra.mxu0 %v4186_v47 }
 0x395   : > { %4191 = vmatprep.subr.bf16.mxu0 %v4190_v60 }
 0x396   : > { %3864 = vmatprep.mubr.msk.f32.mxu0 %vm1410_vm3, %v1539_v1 }
 0x397   : > { %3865 = vmatmul.mubr.msk.f32.gmra.mrb[10].mxu0 %vm1410_vm3, %v1541_v2 }
 0x398   : > { %4193 = vmatpush3.bf16.msra.mxu0 %v4190_v60 }
 0x399   : > { %4195 = vmatprep.subr.bf16.mxu0 %v4194_v3  ;;  %v2177_v20 = vld [vmem:[%s5217_s16] sm:$0xff]  ;;  %v2178_v21 = vld [vmem:[%s5217_s16 + $0x8] sm:$0xff]  ;;  %v2179_v26 = vld [vmem:[%s5217_s16 + $0x10] sm:$0xff] }
 0x39a   : > { %v4238_v25 = vpack.c.bf16 %v2178_v21, %v2177_v20  ;;  %v2183_v35 = vld [vmem:[%s5217_s16 + $0x30] sm:$0xff]  ;;  %v2184_v36 = vld [vmem:[%s5217_s16 + $0x38] sm:$0xff] }
 0x39c   : > { %4197 = vmatpush3.bf16.msra.mxu0 %v4194_v3  ;;  %v1070_v3 = vld [vmem:[%s5215_s23] sm:$0xff] }
 0x39d   : > { %4199 = vmatprep.subr.bf16.mxu0 %v4198_v8 }
 0x3a0   : > { %4201 = vmatpush3.bf16.msra.mxu0 %v4198_v8 }
 0x3a1   : > { %4203 = vmatprep.subr.bf16.mxu0 %v4202_v12 }
 0x3a4   : > { %4205 = vmatpush3.bf16.msra.mxu0 %v4202_v12 }
 0x3a5   : > { %4207 = vmatprep.subr.bf16.mxu0 %v4206_v16 }
 0x3a8   : > { %4209 = vmatpush3.bf16.msra.mxu0 %v4206_v16 }
 0x3a9   : > { %4211 = vmatprep.subr.bf16.mxu0 %v4210_v19 }
 0x3ac   : > { %4213 = vmatpush3.bf16.msra.mxu0 %v4210_v19 }
 0x3ad   : > { %4215 = vmatprep.subr.bf16.mxu0 %v4214_v22 }
 0x3b0   : > { %4217 = vmatpush3.bf16.msra.mxu0 %v4214_v22 }
 0x3b1   : > { %4235 = vmatprep.subr.bf16.mxu0 %v4234_v37 }
 0x466   : > { %v3863_v27 = vpop.f32.mrb[8].mxu0 }
 0x467   : > { %v1622_v28 = vpop.f32.mrb[9].mxu0  ;;  %v1642_v30 = vmul.f32 %v3863_v27, %v4846_v43  ;;  %v1863_v43 = vld [vmem:[%s5206_s3] sm:$0xff]  ;;  %v2180_v27 = vld [vmem:[%s5217_s16 + $0x18] sm:$0xff] }
 0x468   : > { %v1641_v29 = vmul.f32 %v1622_v28, %v4848_v45  ;;  %v1864_v45 = vld [vmem:[%s5206_s3 + $0x8] sm:$0xff]  ;;  %s5221_s3 = sld [smem:[#allocation23_spill]] }
 0x469   : > { %v4222_v38 = vpack.c.bf16 %v1864_v45, %v1863_v43  ;;  %v1071_v28 = vld [vmem:[%s5215_s23 + $0x8] sm:$0xff]  ;;  %v2185_v43 = vld [vmem:[%s5217_s16 + $0x40] sm:$0xff] }
 0x46a   : > { %v3866_v31 = vpop.f32.mrb[10].mxu0  ;;  %3899 = vmatprep.mubr.f32.mxu0 %v1641_v29  ;;  %v1072_v29 = vld [vmem:[%s5215_s23 + $0x10] sm:$0xff]  ;;  %v2186_v45 = vld [vmem:[%s5217_s16 + $0x48] sm:$0xff] }
 0x46b   : > { %v1632_v32 = vpop.f32.mrb[11].mxu0  ;;  %3900 = vmatmul.mubr.f32.vlgmr.msra.gmra.mrb[12].mxu0 %v1642_v30  ;;  %v1644_v34 = vmul.f32 %v3866_v31, %v4853_v53  ;;  %4223 = vmatprep.subr.bf16.mxu1 %v4222_v38  ;;  %v4242_v30 = vpack.c.bf16 %v2180_v27, %v2179_v26  ;;  %v2181_v31 = vld [vmem:[%s5217_s16 + $0x20] sm:$0xff] }
 0x46c   : > { %v1643_v33 = vmul.f32 %v1632_v32, %v4855_v56  ;;  %4237 = vmatpush3.bf16.msra.mxu0 %v4234_v37  ;;  %v2182_v32 = vld [vmem:[%s5217_s16 + $0x28] sm:$0xff]  ;;  %v4250_v37 = vpack.c.bf16 %v2184_v36, %v2183_v35 }
 0x46d   : > { %4271 = vmatprep.subr.bf16.mxu0 %v4879_v23 }
 0x46e   : > { %3902 = vmatprep.mubr.f32.mxu0 %v1643_v33  ;;  %v1073_v33 = vld [vmem:[%s5215_s23 + $0x18] sm:$0xff] }
 0x46f   : > { %3903 = vmatmul.mubr.f32.gmra.mrb[14].mxu0 %v1644_v34  ;;  %v4246_v34 = vpack.c.bf16 %v2182_v32, %v2181_v31 }
 0x53e   : > { %v3901_v40 = vpop.f32.mrb[12].mxu0 }
 0x53f   : > { %v1740_v41 = vadd.f32 %v3901_v40, %v3558_v39  ;;  %v1734_v44 = vpop.f32.mrb[13].mxu0  ;;  %v2188_v40 = vld [vmem:[%s5217_s16 + $0x58] sm:$0xff] }
 0x540   : > { %v1735_v56 = vadd.f32 %v3558_v39, %v1734_v44  ;;  %v2189_v44 = vld [vmem:[%s5217_s16 + $0x60] sm:$0xff] }
 0x541   : > { %v1754_v47 = vmax.f32 %v1740_v41, 0.0 }
 0x542   : > { %v1753_v46 = vmax.f32 %v1735_v56, 0.0  ;;  %v3904_v53 = vpop.f32.mrb[14].mxu0  ;;  %v2190_v56 = vld [vmem:[%s5217_s16 + $0x68] sm:$0xff] }
 0x543   : > { %v1750_v48 = vadd.f32 %v3904_v53, %v3558_v39  ;;  %v1744_v49 = vpop.f32.mrb[15].mxu0  ;;  %v2191_v53 = vld [vmem:[%s5217_s16 + $0x70] sm:$0xff] }
 0x544   : > { %v1745_v50 = vadd.f32 %v3558_v39, %v1744_v49  ;;  %3909 = vmatprep.mubr.msk.f32.mxu1 %vm1410_vm3, %v1753_v46  ;;  %3943 = vmatprep.mubr.msk.f32.mxu0 %vm1410_vm3, %v1753_v46  ;;  %v2187_v39 = vld [vmem:[%s5217_s16 + $0x50] sm:$0xff]  ;;  %v4262_v46 = vpack.c.bf16 %v2190_v56, %v2189_v44 }
 0x545   : > { %3910 = vmatmul.mubr.msk.f32.vlgmr.msra.gmra.mrb[8].mxu1 %vm1410_vm3, %v1754_v47  ;;  %3944 = vmatmul.mubr.msk.f32.vlgmr.msra.gmra.mrb[16].mxu0 %vm1410_vm3, %v1754_v47  ;;  %v1756_v52 = vmax.f32 %v1750_v48, 0.0  ;;  %v4258_v41 = vpack.c.bf16 %v2188_v40, %v2187_v39  ;;  %v2192_v47 = vld [vmem:[%s5217_s16 + $0x78] sm:$0xff] }
 0x546   : > { %v1755_v51 = vmax.f32 %v1745_v50, 0.0  ;;  %4225 = vmatpush3.bf16.msra.mxu1 %v4222_v38  ;;  %4273 = vmatpush3.bf16.msra.mxu0 %v4879_v23  ;;  %v4254_v38 = vpack.c.bf16 %v2186_v45, %v2185_v43  ;;  %v4266_v48 = vpack.c.bf16 %v2192_v47, %v2191_v53  ;;  %v3576_v50 = vld [vmem:[%s5218_s22] ss:$0 sm:$0xff]  ;;  %s5219_s22 = sld [smem:[#allocation17_spill]] }
 0x547   : > { %4275 = vmatprep.subr.bf16.mxu0 %v4889_v42 }
 0x548   : > { %3912 = vmatprep.mubr.msk.f32.mxu1 %vm1410_vm3, %v1755_v51  ;;  %3946 = vmatprep.mubr.msk.f32.mxu0 %vm1410_vm3, %v1755_v51 }
 0x549   : > { %3913 = vmatmul.mubr.msk.f32.gmra.mrb[10].mxu1 %vm1410_vm3, %v1756_v52  ;;  %3947 = vmatmul.mubr.msk.f32.gmra.mrb[18].mxu0 %vm1410_vm3, %v1756_v52 }
 0x54c   : > { %v2508_v36 = vld [vmem:[%s5219_s22] sm:$0xff]  ;;  %v2511_v44 = vld [vmem:[%s5219_s22 + $0x18] sm:$0xff] }
 0x618   : > { %v3911_v55 = vpop.f32.mrb[8].mxu1  ;;  %v4936_v57 = vpop.f32.mrb[16].mxu0 }
 0x619   : > { %v1844_v58 = vpop.f32.mrb[9].mxu1  ;;  %v4938_v59 = vpop.f32.mrb[17].mxu0  ;;  %v1850_v60 = vadd.f32 %v3911_v55, %v3559_v54 }
 0x61a   : > { %v1845_v23 = vadd.f32 %v3559_v54, %v1844_v58 }
 0x61c   : > { %v3914_v61 = vpop.f32.mrb[10].mxu1  ;;  %3919 = vmatprep.mubr.msk.f32.mxu1 %vm1410_vm3, %v1845_v23  ;;  %v4941_v62 = vpop.f32.mrb[18].mxu0 }
 0x61d   : > { %v1854_v63 = vpop.f32.mrb[11].mxu1  ;;  %3920 = vmatmul.mubr.msk.f32.vlgmr.msra.gmra.mrb[12].mxu1 %vm1410_vm3, %v1850_v60  ;;  %v4944_v0 = vpop.f32.mrb[19].mxu0  ;;  %v1860_v2 = vadd.f32 %v3914_v61, %v3559_v54 }
 0x61e   : > { %v1855_v1 = vadd.f32 %v3559_v54, %v1854_v63 }
 0x620   : > { %3922 = vmatprep.mubr.msk.f32.mxu1 %vm1410_vm3, %v1855_v1 }
 0x621   : > { %3923 = vmatmul.mubr.msk.f32.gmra.mrb[14].mxu1 %vm1410_vm3, %v1860_v2 }
 0x622   : > { %3933 = vmatprep.mubr.msk.f32.mxu1 %vm1085_vm1, %v1070_v3 }
 0x6f0   : > { %v3921_v8 = vpop.f32.mrb[12].mxu1 }
 0x6f1   : > { %v1967_v9 = vmul.f32 %v3921_v8, %v1963_v4  ;;  %v1943_v11 = vpop.f32.mrb[13].mxu1 }
 0x6f2   : > { %v1966_v12 = vmul.f32 %v1962_v6, %v1943_v11 }
 0x6f4   : > { %v4226_v16 = vpack.c.bf16 %v1967_v9, %v1966_v12  ;;  %v3924_v17 = vpop.f32.mrb[14].mxu1 }
 0x6f5   : > { %v1969_v18 = vmul.f32 %v3924_v17, %v1965_v13  ;;  %v1953_v19 = vpop.f32.mrb[15].mxu1 }
 0x6f6   : > { %v1968_v22 = vmul.f32 %v1964_v15, %v1953_v19  ;;  %4227 = vmatprep.subr.bf16.mxu1 %v4226_v16 }
 0x6f7   : > { %4229 = vmatpush3.bf16.msra.mxu1 %v4226_v16 }
 0x6f8   : > { %v4230_v24 = vpack.c.bf16 %v1969_v18, %v1968_v22 }
 0x6fa   : > { %4231 = vmatprep.subr.bf16.mxu1 %v4230_v24 }
 0x6fb   : > { %4233 = vmatpush3.bf16.msra.mxu1 %v4230_v24 }
 0x6fc   : > { %4239 = vmatprep.subr.bf16.mxu1 %v4238_v25 }
 0x6fe   : > { %3934 = vmatmul.mubr.msk.f32.vlgmr.msra.gmra.mrb[16].mxu1 %vm1085_vm1, %v1071_v28 }
 0x6ff   : > { %3936 = vmatprep.mubr.msk.f32.mxu1 %vm1085_vm1, %v1072_v29  ;;  %4241 = vmatpush3.bf16.msra.mxu1 %v4238_v25 }
 0x700   : > { %4243 = vmatprep.subr.bf16.mxu1 %v4242_v30 }
 0x702   : > { %3937 = vmatmul.mubr.msk.f32.gmra.mrb[18].mxu1 %vm1085_vm1, %v1073_v33 }
 0x703   : > { %4245 = vmatpush3.bf16.msra.mxu1 %v4242_v30 }
 0x704   : > { %4247 = vmatprep.subr.bf16.mxu1 %v4246_v34 }
 0x707   : > { %4249 = vmatpush3.bf16.msra.mxu1 %v4246_v34 }
 0x708   : > { %4251 = vmatprep.subr.bf16.mxu1 %v4250_v37 }
 0x70b   : > { %4253 = vmatpush3.bf16.msra.mxu1 %v4250_v37  ;;  %v2509_v37 = vld [vmem:[%s5219_s22 + $0x8] sm:$0xff] }
 0x70c   : > { %4255 = vmatprep.subr.bf16.mxu1 %v4254_v38  ;;  %v4278_v43 = vpack.c.bf16 %v2509_v37, %v2508_v36  ;;  %v2719_v36 = vld [vmem:[%s5223_s4] sm:$0xff] }
 0x70f   : > { %4257 = vmatpush3.bf16.msra.mxu1 %v4254_v38 }
 0x710   : > { %4259 = vmatprep.subr.bf16.mxu1 %v4258_v41 }
 0x713   : > { %4261 = vmatpush3.bf16.msra.mxu1 %v4258_v41  ;;  %v2510_v41 = vld [vmem:[%s5219_s22 + $0x10] sm:$0xff] }
 0x714   : > { %4263 = vmatprep.subr.bf16.mxu1 %v4262_v46  ;;  %v4282_v47 = vpack.c.bf16 %v2511_v44, %v2510_v41 }
 0x717   : > { %4265 = vmatpush3.bf16.msra.mxu1 %v4262_v46 }
 0x718   : > { %4267 = vmatprep.subr.bf16.mxu1 %v4266_v48 }
 0x71b   : > { %4269 = vmatpush3.bf16.msra.mxu1 %v4266_v48 }
 0x7d1   : > { %v4976_v49 = vpop.f32.mrb[16].mxu1 }
 0x7d2   : > { %v2155_v51 = vadd.f32 %v4936_v57, %v4976_v49  ;;  %v4981_v52 = vpop.f32.mrb[17].mxu1 }
 0x7d3   : > { %v2154_v54 = vadd.f32 %v4938_v59, %v4981_v52 }
 0x7d4   : > { %v2166_v55 = vadd.f32 %v3576_v50, %v2155_v51  ;;  %v2513_v51 = vld [vmem:[%s5219_s22 + $0x28] sm:$0xff] }
 0x7d5   : > { %v2165_v58 = vadd.f32 %v3576_v50, %v2154_v54  ;;  %v4985_v23 = vpop.f32.mrb[18].mxu1 }
 0x7d6   : > { %v2170_v60 = vmul.f32 0.2, %v2166_v55  ;;  %v2157_v61 = vadd.f32 %v4941_v62, %v4985_v23  ;;  %v4989_v63 = vpop.f32.mrb[19].mxu1 }
 0x7d7   : > { %v2169_v1 = vmul.f32 0.2, %v2165_v58  ;;  %v2156_v2 = vadd.f32 %v4944_v0, %v4989_v63 }
 0x7d8   : > { %v2168_v57 = vadd.f32 %v3576_v50, %v2157_v61  ;;  %v2174_v6 = vmax.f32 %v2166_v55, %v2170_v60  ;;  %v2514_v61 = vld [vmem:[%s5219_s22 + $0x30] sm:$0xff] }
 0x7d9   : > { %v2167_v3 = vadd.f32 %v3576_v50, %v2156_v2  ;;  %v2173_v4 = vmax.f32 %v2165_v58, %v2169_v1  ;;  %v2512_v50 = vld [vmem:[%s5219_s22 + $0x20] sm:$0xff]  ;;  %v2515_v1 = vld [vmem:[%s5219_s22 + $0x38] sm:$0xff] }
 0x7da   : > { %v2172_v8 = vmul.f32 0.2, %v2168_v57  ;;  %v4286_v60 = vpack.c.bf16 %v2513_v51, %v2512_v50  ;;  %v4290_v2 = vpack.c.bf16 %v2515_v1, %v2514_v61  ;;  %v2727_v50 = vld [vmem:[%s5225_s5] sm:$0xf]  ;;  %s5226_s5 = sld [smem:[#allocation26_spill]] }
 0x7db   : > { %v2171_v59 = vmul.f32 0.2, %v2167_v3  ;;  %3981 = vmatprep.mubr.f32.mxu1 %v2173_v4 }
 0x7dc   : > { %3982 = vmatmul.mubr.f32.vlgmr.msra.gmra.mrb[20].mxu1 %v2174_v6  ;;  %v2176_v11 = vmax.f32 %v2168_v57, %v2172_v8  ;;  %v2516_v57 = vld [vmem:[%s5219_s22 + $0x40] sm:$0xff]  ;;  %v2518_v6 = vld [vmem:[%s5219_s22 + $0x50] sm:$0xff]  ;;  %v2519_v8 = vld [vmem:[%s5219_s22 + $0x58] sm:$0xff] }
 0x7dd   : > { %v2175_v9 = vmax.f32 %v2167_v3, %v2171_v59  ;;  %v2517_v3 = vld [vmem:[%s5219_s22 + $0x48] sm:$0xff]  ;;  %v4298_v59 = vpack.c.bf16 %v2519_v8, %v2518_v6 }
 0x7de   : > { %v4294_v4 = vpack.c.bf16 %v2517_v3, %v2516_v57 }
 0x7df   : > { %3984 = vmatprep.mubr.f32.mxu1 %v2175_v9  ;;  %v2520_v9 = vld [vmem:[%s5219_s22 + $0x60] sm:$0xff] }
 0x7e0   : > { %3985 = vmatmul.mubr.f32.gmra.mrb[22].mxu1 %v2176_v11  ;;  %v2521_v11 = vld [vmem:[%s5219_s22 + $0x68] sm:$0xff] }
 0x8af   : > { %v3983_v12 = vpop.f32.mrb[20].mxu1 }
 0x8b0   : > { %v2265_v62 = vadd.f32 %v3983_v12, %v4863_v7  ;;  %v2259_v13 = vpop.f32.mrb[21].mxu1  ;;  %v4302_v12 = vpack.c.bf16 %v2521_v11, %v2520_v9 }
 0x8b1   : > { %v2260_v15 = vadd.f32 %v2259_v13, %v4861_v5  ;;  %v2523_v13 = vld [vmem:[%s5219_s22 + $0x78] sm:$0xff] }
 0x8b2   : > { %v2281_v0 = vsel %vm1410_vm3, %v2265_v62, -inf }
 0x8b3   : > { %2282 = vmax.xlane.f32.xlu1 %v2281_v0  ;;  %v3986_v16 = vpop.f32.mrb[22].mxu1  ;;  %v2278_v17 = vsel %vm1410_vm3, %v2260_v15, -inf  ;;  %v2620_v0 = vld [vmem:[%s5220_s2] sm:$0xff]  ;;  %s5222_s2 = sld [smem:[#allocation25_spill]] }
 0x8b4   : > { %v2275_v18 = vadd.f32 %v3986_v16, %v4870_v14  ;;  %2279 = vmax.xlane.f32.xlu0 %v2278_v17  ;;  %v2269_v19 = vpop.f32.mrb[23].mxu1  ;;  %4045 = vmatprep.subr.mxu1 %v2620_v0 }
 0x8b5   : > { %v2270_v20 = vadd.f32 %v2269_v19, %v4866_v10  ;;  %4046 = vmatpush3.msra.mxu1 %v2620_v0 }
 0x8b6   : > { %v2287_v21 = vsel %vm1410_vm3, %v2275_v18, -inf }
 0x8b7   : > { %2288 = vmax.xlane.f32.xlu1 %v2287_v21  ;;  %v2284_v7 = vsel %vm1410_vm3, %v2270_v20, -inf }
 0x8b8   : > { %2285 = vmax.xlane.f32.xlu0 %v2284_v7 }
 0x8b9   : > { %v2893_v6 = vld [vmem:[%s5222_s2 + $0x18] sm:$0xff] }
 0x940   : > { %v2283_v22 = vpop.xlane.xlu1 %2282 }
 0x941   : > { %v2291_v5 = vsub.f32 %v2265_v62, %v2283_v22  ;;  %v2280_v24 = vpop.xlane.xlu0 %2279  ;;  %v2522_v62 = vld [vmem:[%s5219_s22 + $0x70] sm:$0xff] }
 0x942   : > { %v2290_v25 = vsub.f32 %v2260_v15, %v2280_v24  ;;  %v4306_v15 = vpack.c.bf16 %v2523_v13, %v2522_v62  ;;  %v3591_v62 = vld [vmem:[%s5226_s5] ss:$0 sm:$0xff]  ;;  %s4584_s5 = smov 32  }
 0x943   : > { %v2296_v26 = vmul.f32 1.442695, %v2291_v5  ;;  %v3585_v5 = vld [vmem:[%s5221_s3] ss:$0 sm:$0xff]  ;;  %s5224_s3 = sld [smem:[#allocation24_spill]] }
 0x944   : > { %v2294_v27 = vmul.f32 1.442695, %v2290_v25  ;;  %v2289_v28 = vpop.xlane.xlu1 %2288 }
 0x945   : > { %v2293_v29 = vsub.f32 %v2275_v18, %v2289_v28  ;;  %v2286_v30 = vpop.xlane.xlu0 %2285 }
 0x946   : > { %4451 = vpow2.f32 %v2294_v27  ;;  %v2292_v14 = vsub.f32 %v2270_v20, %v2286_v30 }
 0x947   : > { %4453 = vpow2.f32 %v2296_v26  ;;  %v2300_v10 = vmul.f32 1.442695, %v2293_v29 }
 0x948   : > { %v2298_v31 = vmul.f32 1.442695, %v2292_v14 }
 0x949   : > { %v2806_v61 = vld [vmem:[%s5224_s3 + $0x28] sm:$0xff]  ;;  %v2808_v57 = vld [vmem:[%s5224_s3 + $0x38] sm:$0xff] }
 0x94a   : > { %4455 = vpow2.f32 %v2298_v31  ;;  %v4582_v31 = vmov 0.0  }
 0x94b   : > { %4457 = vpow2.f32 %v2300_v10  ;;  %v4580_v10 = vmov 0.0|0.0  }
 0x94c   : > { %4310 = vmatprep.subr.bf16.mxu1 %v4580_v10 }
 0x950   : > { %v4452_v32 = vpop.eup %4451 }
 0x951   : > { %v4454_v33 = vpop.eup %4453  ;;  %3991 = vmatprep.mubr.msk.f32.mxu0 %vm1410_vm3, %v4452_v32 }
 0x952   : > { %3992 = vmatmul.mubr.msk.f32.vlgmr.msra.gmra.mrb[20].mxu0 %vm1410_vm3, %v4454_v33 }
 0x953   : > { %4277 = vmatpush3.bf16.msra.mxu0 %v4889_v42 }
 0x954   : > { %v4456_v34 = vpop.eup %4455  ;;  %4279 = vmatprep.subr.bf16.mxu0 %v4278_v43 }
 0x955   : > { %v4458_v35 = vpop.eup %4457  ;;  %3994 = vmatprep.mubr.msk.f32.mxu0 %vm1410_vm3, %v4456_v34 }
 0x956   : > { %3995 = vmatmul.mubr.msk.f32.gmra.mrb[22].mxu0 %vm1410_vm3, %v4458_v35 }
 0xa25   : > { %v3993_v45 = vpop.f32.mrb[20].mxu0 }
 0xa26   : > { %4459 = vrcp.f32 %v3993_v45  ;;  %v2380_v38 = vpop.f32.mrb[21].mxu0 }
 0xa27   : > { %4461 = vrcp.f32 %v2380_v38 }
 0xa29   : > { %v3996_v39 = vpop.f32.mrb[22].mxu0 }
 0xa2a   : > { %4463 = vrcp.f32 %v3996_v39  ;;  %v2390_v42 = vpop.f32.mrb[23].mxu0  ;;  %v2722_v39 = vld [vmem:[%s5223_s4 + $0x18] sm:$0xff] }
 0xa2b   : > { %4465 = vrcp.f32 %v2390_v42  ;;  %v2721_v42 = vld [vmem:[%s5223_s4 + $0x10] sm:$0xff] }
 0xa30   : > { %v4460_v40 = vpop.eup %4459 }
 0xa31   : > { %v4462_v56 = vpop.eup %4461  ;;  %v2402_v53 = vmul.f32 %v4460_v40, %v4454_v33  ;;  %v2891_v33 = vld [vmem:[%s5222_s2 + $0x8] sm:$0xff] }
 0xa32   : > { %v2400_v46 = vmul.f32 %v4462_v56, %v4452_v32  ;;  %v2890_v32 = vld [vmem:[%s5222_s2] sm:$0xff] }
 0xa34   : > { %v4464_v48 = vpop.eup %4463  ;;  %4001 = vmatprep.mubr.msk.f32.mxu0 %vm1410_vm3, %v2400_v46 }
 0xa35   : > { %v4466_v54 = vpop.eup %4465  ;;  %4002 = vmatmul.mubr.msk.f32.vlgmr.msra.gmra.mrb[24].mxu0 %vm1410_vm3, %v2402_v53  ;;  %v2406_v58 = vmul.f32 %v4464_v48, %v4458_v35  ;;  %v2720_v35 = vld [vmem:[%s5223_s4 + $0x8] sm:$0xff]  ;;  %v2801_v53 = vld [vmem:[%s5224_s3] sm:$0xff]  ;;  %s4583_s4 = smov 64  }
 0xa36   : > { %v2404_v55 = vmul.f32 %v4466_v54, %v4456_v34  ;;  %4281 = vmatpush3.bf16.msra.mxu0 %v4278_v43  ;;  %v5040_v34 = vpack.c.bf16 %v2891_v33, %v2890_v32  ;;  %v2803_v54 = vld [vmem:[%s5224_s3 + $0x10] sm:$0xff] }
 0xa37   : > { %4283 = vmatprep.subr.bf16.mxu0 %v4282_v47 }
 0xa38   : > { %4004 = vmatprep.mubr.msk.f32.mxu0 %vm1410_vm3, %v2404_v55  ;;  %v2804_v55 = vld [vmem:[%s5224_s3 + $0x18] sm:$0xff] }
 0xa39   : > { %4005 = vmatmul.mubr.msk.f32.gmra.mrb[26].mxu0 %vm1410_vm3, %v2406_v58  ;;  %v4320_v58 = vpack.c.bf16 %v2804_v55, %v2803_v54 }
 0xa3a   : > { %4285 = vmatpush3.bf16.msra.mxu0 %v4282_v47  ;;  %v2802_v47 = vld [vmem:[%s5224_s3 + $0x8] sm:$0xff] }
 0xa3b   : > { %4287 = vmatprep.subr.bf16.mxu0 %v4286_v60  ;;  %v4317_v51 = vpack.c.bf16 %v2802_v47, %v2801_v53 }
 0xa3e   : > { %4289 = vmatpush3.bf16.msra.mxu0 %v4286_v60  ;;  %v2805_v60 = vld [vmem:[%s5224_s3 + $0x20] sm:$0xff] }
 0xa3f   : > { %4291 = vmatprep.subr.bf16.mxu0 %v4290_v2  ;;  %v4323_v1 = vpack.c.bf16 %v2806_v61, %v2805_v60 }
 0xa42   : > { %4293 = vmatpush3.bf16.msra.mxu0 %v4290_v2  ;;  %v2807_v2 = vld [vmem:[%s5224_s3 + $0x30] sm:$0xff]  ;;  %s5227_s3 = sld [smem:[#allocation27_spill]] }
 0xa43   : > { %4295 = vmatprep.subr.bf16.mxu0 %v4294_v4  ;;  %v4326_v3 = vpack.c.bf16 %v2808_v57, %v2807_v2 }
 0xa46   : > { %4297 = vmatpush3.bf16.msra.mxu0 %v4294_v4  ;;  %v2892_v4 = vld [vmem:[%s5222_s2 + $0x10] sm:$0xff]  ;;  %s5228_s2 = sld [smem:[#allocation28_spill]] }
 0xa47   : > { %4299 = vmatprep.subr.bf16.mxu0 %v4298_v59  ;;  %v4332_v8 = vpack.c.bf16 %v2893_v6, %v2892_v4 }
 0xa4a   : > { %4301 = vmatpush3.bf16.msra.mxu0 %v4298_v59 }
 0xa4b   : > { %4303 = vmatprep.subr.bf16.mxu0 %v4302_v12 }
 0xa4e   : > { %4305 = vmatpush3.bf16.msra.mxu0 %v4302_v12 }
 0xa4f   : > { %4307 = vmatprep.subr.bf16.mxu0 %v4306_v15 }
 0xa52   : > { %4309 = vmatpush3.bf16.msra.mxu0 %v4306_v15 }
 0xa53   : > { %4328 = vmatprep.subr.bf16.mxu0 %v4580_v10 }
 0xb08   : > { %v4003_v16 = vpop.f32.mrb[24].mxu0 }
 0xb09   : > { %v2505_v17 = vmul.f32 %v4003_v16, %v4976_v49  ;;  %v2485_v18 = vpop.f32.mrb[25].mxu0  ;;  %v2894_v16 = vld [vmem:[%s5227_s3] sm:$0x1]  ;;  %s3597_s3 = sshll.u32 %s4782_s0, 4  ;;  %s4585_s0 = smov [#allocation2]  }
 0xb0a   : > { %v2504_v19 = vmul.f32 %v2485_v18, %v4981_v52  ;;  %s4487_s13 = sshll.u32 %s4585_s0, 4  ;;  %s4488_s13 = int_to_ptr.vmem [resolvable:$false] %s4487_s13 }
 0xb0b   : > { %s4489_s14 = scalar_lea.vmem %s4488_s13, 32 }
 0xb0c   : > { %v4006_v20 = vpop.f32.mrb[26].mxu0  ;;  %4039 = vmatprep.mubr.f32.mxu0 %v2504_v19  ;;  %v2895_v19 = vld [vmem:[%s5228_s2] sm:$0x1]  ;;  %s1038_s2 = sand.u32 1, %s4537_s10  }
 0xb0d   : > { %v2507_v21 = vmul.f32 %v4006_v20, %v4985_v23  ;;  %v2495_v7 = vpop.f32.mrb[27].mxu0  ;;  %4040 = vmatmul.mubr.f32.vlgmr.msra.gmra.mrb[28].mxu0 %v2505_v17  ;;  %s1039_s6 = scalar_lea.vmem [#allocation2], %s1038_s2 }
 0xb0e   : > { %v2506_v22 = vmul.f32 %v2495_v7, %v4989_v63  ;;  %4330 = vmatpush3.bf16.msra.mxu0 %v5040_v34  ;;  %s3417_s8 = sshll.u32 %s1039_s6, 4  ;;  %s5127_s8 = int_to_ptr.vmem [resolvable:$true] %s3417_s8 }
 0xb0f   : > { %4331 = vmatprep.subr.bf16.mxu0 %v4580_v10  ;;  %s4483_s9 = scalar_lea.vmem %s5127_s8, 16  ;;  %p4490_p0 = scmp.lt.s32.totalorder %s5127_s8, %s4488_s13 }
 0xb10   : > { %4042 = vmatprep.mubr.f32.mxu0 %v2506_v22  ;;  %p4484_p11 = scmp.ne.s32.totalorder %s5127_s8, %s4483_s9  ;;  %p4491_p1 = scmp.lt.s32.totalorder %s4489_s14, %s4483_s9 }
 0xb11   : > { %4043 = vmatmul.mubr.f32.gmra.mrb[30].mxu0 %v2507_v21  ;;  %v2896_v21 = vld [vmem:[%s4744_s25] sm:$0x1] }
 0xb12   : > { %4091 = vmatprep.mubr.msk.f32.mxu0 %vm4581_vm5, %v4582_v31  ;;  %4333 = vmatpush3.bf16.msra.mxu0 %v4332_v8  ;;  %p4485_p12 = pnand %p4484_p11, %p4799_p5  ;;  %p4492_p2 = por %p4491_p1, %p4490_p0 }
 0xb13   : > { %4334 = vmatprep.subr.bf16.mxu0 %v4580_v10 }
 0xb14   : > { %p4486_p13 = pneg %p4485_p12 }
 0xb15   : > { %4092 = vmatmul.mubr.f32.vlgmr.msra.gmra.mrb[32].mxu0 %v4582_v31 }
 0xb16   : > { %4336 = vmatpush3.bf16.msra.mxu0 %v5040_v34  ;;  %4102 = vmatprep.mubr.msk.f32.mxu0 %vm4581_vm5, %v4582_v31  ;;  %p4493_p3 = pnand %p4492_p2, %p4486_p13 }
 0xb17   : > { %4337 = vmatprep.subr.bf16.mxu0 %v4580_v10 }
 0xb1a   : > { %4339 = vmatpush3.bf16.msra.mxu0 %v4332_v8 }
 0xb1b   : > { %4346 = vmatprep.subr.bf16.mxu0 %v4580_v10 }
 0xbe0   : > { %v4041_v24 = vpop.f32.mrb[28].mxu0 }
 0xbe1   : > { %v2603_v25 = vadd.f32 %v4041_v24, %v3585_v5  ;;  %v2597_v26 = vpop.f32.mrb[29].mxu0 }
 0xbe2   : > { %v2598_v27 = vadd.f32 %v3585_v5, %v2597_v26 }
 0xbe3   : > { %v2617_v29 = vmax.f32 %v2603_v25, 0.0 }
 0xbe4   : > { %v2616_v49 = vmax.f32 %v2598_v27, 0.0  ;;  %v4044_v28 = vpop.f32.mrb[30].mxu0 }
 0xbe5   : > { %v2613_v52 = vadd.f32 %v4044_v28, %v3585_v5  ;;  %v2607_v30 = vpop.f32.mrb[31].mxu0 }
 0xbe6   : > { %v2608_v23 = vadd.f32 %v3585_v5, %v2607_v30  ;;  %4047 = vmatprep.mubr.msk.f32.mxu1 %vm2621_vm4, %v2616_v49  ;;  %v3072_v30 = vlaneseq }
 0xbe7   : > { %4048 = vmatmul.mubr.msk.f32.vlgmr.msra.gmra.mrb[24].mxu1 %vm2621_vm4, %v2617_v29  ;;  %v2619_v63 = vmax.f32 %v2613_v52, 0.0 }
 0xbe8   : > { %v2618_v14 = vmax.f32 %v2608_v23, 0.0  ;;  %v2966_v11 = vpop.f32.mrb[32].mxu0  ;;  %v3073_v23 = vshrl.u32 %v3072_v30, 7 }
 0xbe9   : > { %v4093_v12 = vpop.f32.mrb[33].mxu0 }
 0xbea   : > { %4050 = vmatprep.mubr.msk.f32.mxu1 %vm2621_vm4, %v2618_v14  ;;  %v3074_v14 = vsub.s32 0, %v3073_v23 }
 0xbeb   : > { %4051 = vmatmul.mubr.msk.f32.gmra.mrb[26].mxu1 %vm2621_vm4, %v2619_v63 }
 0xbec   : > { %4061 = vmatprep.mubr.msk.f32.mxu1 %vm4581_vm5, %v4582_v31  ;;  %v3075_v32 = vrot.slane %v2894_v16, %v3074_v14 }
 0xcba   : > { %v4049_v37 = vpop.f32.mrb[24].mxu1 }
 0xcbb   : > { %v2724_v43 = vmul.f32 %v4049_v37, %v2720_v35  ;;  %v2700_v45 = vpop.f32.mrb[25].mxu1 }
 0xcbc   : > { %v2723_v38 = vmul.f32 %v2719_v36, %v2700_v45  ;;  %v3090_v45 = vrot.slane %v2896_v21, %v3074_v14 }
 0xcbe   : > { %v4311_v40 = vpack.c.bf16 %v2724_v43, %v2723_v38  ;;  %v4052_v41 = vpop.f32.mrb[26].mxu1  ;;  %v3083_v43 = vrot.slane %v2895_v19, %v3074_v14 }
 0xcbf   : > { %v2726_v44 = vmul.f32 %v4052_v41, %v2722_v39  ;;  %v2710_v56 = vpop.f32.mrb[27].mxu1 }
 0xcc0   : > { %v2725_v46 = vmul.f32 %v2721_v42, %v2710_v56  ;;  %4312 = vmatpush3.bf16.msra.mxu1 %v4311_v40 }
 0xcc1   : > { %4313 = vmatprep.subr.bf16.mxu1 %v4580_v10 }
 0xcc2   : > { %v4314_v48 = vpack.c.bf16 %v2726_v44, %v2725_v46 }
 0xcc4   : > { %4315 = vmatpush3.bf16.msra.mxu1 %v4314_v48 }
 0xcc5   : > { %4316 = vmatprep.subr.bf16.mxu1 %v4580_v10 }
 0xcc7   : > { %4062 = vmatmul.mubr.msk.f32.vlgmr.msra.gmra.mrb[28].mxu1 %vm1085_vm1, %v2727_v50 }
 0xcc8   : > { %4318 = vmatpush3.bf16.msra.mxu1 %v4317_v51  ;;  %4080 = vmatprep.mubr.msk.f32.mxu1 %vm4581_vm5, %v4582_v31 }
 0xcc9   : > { %4319 = vmatprep.subr.bf16.mxu1 %v4580_v10 }
 0xccc   : > { %4321 = vmatpush3.bf16.msra.mxu1 %v4320_v58 }
 0xccd   : > { %4322 = vmatprep.subr.bf16.mxu1 %v4580_v10 }
 0xcd0   : > { %4324 = vmatpush3.bf16.msra.mxu1 %v4323_v1 }
 0xcd1   : > { %4325 = vmatprep.subr.bf16.mxu1 %v4580_v10 }
 0xcd4   : > { %4327 = vmatpush3.bf16.msra.mxu1 %v4326_v3 }
 0xcd5   : > { %4340 = vmatprep.subr.bf16.mxu1 %v4580_v10 }
 0xd9a   : > { %v2797_v59 = vpop.f32.mrb[28].mxu1 }
 0xd9b   : > { %v4063_v9 = vpop.f32.mrb[29].mxu1  ;;  %4081 = vmatmul.mubr.msk.f32.vlgmr.msra.gmra.mrb[30].mxu1 %vm2816_vm6, %v2797_v59 }
 0xd9c   : > { %4342 = vmatpush3.bf16.msra.mxu1 %v5040_v34  ;;  %4113 = vmatprep.mubr.msk.f32.mxu1 %vm4581_vm5, %v4582_v31 }
 0xd9d   : > { %4343 = vmatprep.subr.bf16.mxu1 %v4580_v10 }
 0xda0   : > { %4345 = vmatpush3.bf16.msra.mxu1 %v4332_v8 }
 0xda1   : > { %4352 = vmatprep.subr.bf16.mxu1 %v4580_v10 }
 0xe6e   : > { %v2886_v13 = vpop.f32.mrb[30].mxu1 }
 0xe6f   : > { %v5081_v15 = vadd.f32 %v3591_v62, %v2886_v13  ;;  %v4082_v0 = vpop.f32.mrb[31].mxu1 }
 0xe71   : > { %v2970_v17 = vadd.f32 %v2966_v11, %v5081_v15 }
 0xe73   : > { %v2971_v18 = vmul.f32 %v2970_v17, %v2894_v16 }
 0xe75   : > { %4467 = vtanh.f32 %v2971_v18 }
 0xe7f   : > { %v4468_v20 = vpop.eup %4467 }
 0xe80   : > { %v2973_v7 = vmul.f32 %v4468_v20, %v2895_v19 }
 0xe82   : > { %v2974_v22 = vadd.f32 %v2973_v7, %v2896_v21 }
 0xe84   : > { %2977 = vrot.lane.b32.xlu0 %v2974_v22, %s4583_s4  ;;  %v2975_v25 = vmul.f32 0.0, %v2974_v22 }
 0xef6   : > { %v2978_v5 = vpop.permute.xlu0 %2977 }
 0xef7   : > { %v2980_v24 = vmul.f32 %v2978_v5, %v2974_v22 }
 0xef9   : > { %2982 = vrot.lane.b32.xlu1 %v2980_v24, %s4584_s5 }
 0xf6b   : > { %v2983_v26 = vpop.permute.xlu1 %2982 }
 0xf6c   : > { %v2985_v27 = vadd.f32 %v2983_v26, %v2975_v25 }
 0xf6e   : > { %4469 = vtanh.f32 %v2985_v27  ;;  %v3094_v41 = vrot.slane %v2985_v27, 7 }
 0xf78   : > { %v4470_v49 = vpop.eup %4469 }
 0xf79   : > { %2988 = vrot.lane.b32.xlu1 %v4470_v49, %s4583_s4  ;;  %v3322_v49 = vld [vmem:[%s4749_s21 + $0x8] sm:$0xff] }
 0xfeb   : > { %v2989_v28 = vpop.permute.xlu1 %2988 }
 0xfec   : > { %v2991_v29 = vmul.f32 %v2989_v28, %v2974_v22  ;;  %v3323_v28 = vld [vmem:[%s4749_s21 + $0x10] sm:$0xff] }
 0xfee   : > { %2993 = vrot.lane.b32.xlu1 %v2991_v29, %s4584_s5 }
0x1060   : > { %v2994_v52 = vpop.permute.xlu1 %2993 }
0x1061   : > { %4103 = vmatmul.mubr.msk.f32.vlgmr.msra.gmra.mrb[34].mxu0 %vm1085_vm1, %v2994_v52  ;;  %v3324_v52 = vld [vmem:[%s4749_s21 + $0x18] sm:$0xff] }
0x1062   : > { %4348 = vmatpush3.bf16.msra.mxu0 %v5040_v34  ;;  %4124 = vmatprep.mubr.msk.f32.mxu0 %vm4581_vm5, %v4582_v31  ;;  %v4356_v30 = vpack.c.bf16 %v3324_v52, %v3323_v28 }
0x1063   : > { %4349 = vmatprep.subr.bf16.mxu0 %v4580_v10 }
0x1066   : > { %4351 = vmatpush3.bf16.msra.mxu0 %v4332_v8 }
0x1134   : > { %v3063_v63 = vpop.f32.mrb[34].mxu0 }
0x1135   : > { %v3068_v33 = vrot.slane %v3063_v63, 7  ;;  %v4104_v35 = vpop.f32.mrb[35].mxu0 }
0x1136   : > { %v3325_v35 = vld [vmem:[%s4754_s17] sm:$0x1] }
0x1137   : > { %v3070_v36 = vadd.f32 %v3068_v33, %v5081_v15 }
0x1139   : > { %v3077_v37 = vmul.f32 %v3075_v32, %v3070_v36 }
0x113b   : > { %4471 = vtanh.f32 %v3077_v37 }
0x1145   : > { %v4472_v34 = vpop.eup %4471 }
0x1146   : > { %v3085_v38 = vmul.f32 %v4472_v34, %v3083_v43 }
0x1148   : > { %v3092_v39 = vadd.f32 %v3090_v45, %v3085_v38 }
0x114a   : > { %3098 = vrot.lane.b32.xlu0 %v3092_v39, %s4583_s4  ;;  %v3096_v44 = vmul.f32 %v3094_v41, %v3092_v39 }
0x11bc   : > { %v3099_v42 = vpop.permute.xlu0 %3098 }
0x11bd   : > { %v3101_v40 = vmul.f32 %v3099_v42, %v3092_v39 }
0x11bf   : > { %3103 = vrot.lane.b32.xlu1 %v3101_v40, %s4584_s5 }
0x1231   : > { %v3104_v56 = vpop.permute.xlu1 %3103 }
0x1232   : > { %v3106_v46 = vadd.f32 %v3104_v56, %v3096_v44 }
0x1234   : > { %4473 = vtanh.f32 %v3106_v46  ;;  %v3198_v6 = vrot.slane %v3106_v46, 7 }
0x123e   : > { %v4474_v53 = vpop.eup %4473 }
0x123f   : > { %3109 = vrot.lane.b32.xlu0 %v4474_v53, %s4583_s4 }
0x12b1   : > { %v3110_v47 = vpop.permute.xlu0 %3109 }
0x12b2   : > { %v3112_v48 = vmul.f32 %v3110_v47, %v3092_v39 }
0x12b4   : > { %v3114_v50 = vrot.slane %v3112_v48, 1 }
0x12b6   : > { %3115 = vrot.lane.b32.xlu1 %v3114_v50, %s4584_s5 }
0x1328   : > { %v3116_v51 = vpop.permute.xlu1 %3115 }
0x1329   : > { %4114 = vmatmul.mubr.msk.f32.vlgmr.msra.gmra.mrb[32].mxu1 %vm1085_vm1, %v3116_v51 }
0x132a   : > { %4135 = vmatprep.mubr.msk.f32.mxu1 %vm4581_vm5, %v4582_v31 }
0x13fc   : > { %v3185_v54 = vpop.f32.mrb[32].mxu1 }
0x13fd   : > { %v3190_v55 = vrot.slane %v3185_v54, 6  ;;  %v4115_v58 = vpop.f32.mrb[33].mxu1 }
0x13ff   : > { %v3192_v60 = vadd.f32 %v3190_v55, %v5081_v15 }
0x1401   : > { %v3193_v61 = vmul.f32 %v3192_v60, %v3075_v32 }
0x1403   : > { %4475 = vtanh.f32 %v3193_v61 }
0x140d   : > { %v4476_v1 = vpop.eup %4475 }
0x140e   : > { %v3195_v2 = vmul.f32 %v4476_v1, %v3083_v43 }
0x1410   : > { %v3196_v57 = vadd.f32 %v3195_v2, %v3090_v45 }
0x1412   : > { %3202 = vrot.lane.b32.xlu0 %v3196_v57, %s4583_s4  ;;  %v3200_v8 = vmul.f32 %v3198_v6, %v3196_v57 }
0x1484   : > { %v3203_v3 = vpop.permute.xlu0 %3202 }
0x1485   : > { %v3205_v4 = vmul.f32 %v3203_v3, %v3196_v57 }
0x1487   : > { %3207 = vrot.lane.b32.xlu1 %v3205_v4, %s4584_s5 }
0x14f9   : > { %v3208_v59 = vpop.permute.xlu1 %3207 }
0x14fa   : > { %v3210_v31 = vadd.f32 %v3208_v59, %v3200_v8 }
0x14fc   : > { %4477 = vtanh.f32 %v3210_v31  ;;  %v3302_v24 = vrot.slane %v3210_v31, 7 }
0x1506   : > { %v4478_v9 = vpop.eup %4477 }
0x1507   : > { %3213 = vrot.lane.b32.xlu0 %v4478_v9, %s4583_s4 }
0x1579   : > { %v3214_v11 = vpop.permute.xlu0 %3213 }
0x157a   : > { %v3216_v12 = vmul.f32 %v3214_v11, %v3196_v57 }
0x157c   : > { %v3218_v62 = vrot.slane %v3216_v12, 2 }
0x157e   : > { %3219 = vrot.lane.b32.xlu1 %v3218_v62, %s4584_s5 }
0x15f0   : > { %v3220_v13 = vpop.permute.xlu1 %3219 }
0x15f1   : > { %4125 = vmatmul.mubr.msk.f32.vlgmr.msra.gmra.mrb[36].mxu0 %vm1085_vm1, %v3220_v13 }
0x16c4   : > { %v3289_v0 = vpop.f32.mrb[36].mxu0 }
0x16c5   : > { %v3294_v16 = vrot.slane %v3289_v0, 5  ;;  %v4126_v17 = vpop.f32.mrb[37].mxu0 }
0x16c7   : > { %v3296_v18 = vadd.f32 %v3294_v16, %v5081_v15  ;;  %v3321_v15 = vld [vmem:[%s4749_s21] sm:$0xff] }
0x16c8   : > { %v4353_v29 = vpack.c.bf16 %v3322_v49, %v3321_v15 }
0x16c9   : > { %v3297_v19 = vmul.f32 %v3296_v18, %v3075_v32 }
0x16ca   : > { %4354 = vmatpush3.bf16.msra.mxu1 %v4353_v29 }
0x16cb   : > { %4479 = vtanh.f32 %v3297_v19  ;;  %4355 = vmatprep.subr.bf16.mxu1 %v4580_v10 }
0x16ce   : > { %4357 = vmatpush3.bf16.msra.mxu1 %v4356_v30 }
0x16d5   : > { %v4480_v20 = vpop.eup %4479 }
0x16d6   : > { %v3299_v21 = vmul.f32 %v4480_v20, %v3083_v43 }
0x16d8   : > { %v3300_v7 = vadd.f32 %v3299_v21, %v3090_v45 }
0x16da   : > { %3306 = vrot.lane.b32.xlu0 %v3300_v7, %s4583_s4  ;;  %v3304_v25 = vmul.f32 %v3302_v24, %v3300_v7 }
0x174c   : > { %v3307_v22 = vpop.permute.xlu0 %3306 }
0x174d   : > { %v3309_v5 = vmul.f32 %v3307_v22, %v3300_v7 }
0x174f   : > { %3311 = vrot.lane.b32.xlu1 %v3309_v5, %s4584_s5 }
0x17c1   : > { %v3312_v26 = vpop.permute.xlu1 %3311 }
0x17c2   : > { %v3314_v27 = vadd.f32 %v3312_v26, %v3304_v25 }
0x17c4   : > { %4481 = vtanh.f32 %v3314_v27 }
0x17ce   : > { %v4482_v23 = vpop.eup %4481 }
0x17cf   : > { %3317 = vrot.lane.b32.xlu0 %v4482_v23, %s4583_s4  ;;  %s5125_s4 = scalar_lea.hbm %s4759_s12, %s3597_s3 }
0x1841   : > { %v3318_v14 = vpop.permute.xlu0 %3317 }
0x1842   : > { %v3320_v63 = vmul.f32 %v3318_v14, %v3300_v7 }
0x1844   : > { %v3327_v32 = vrot.slane %v3320_v63, 3 }
0x1846   : > { %3328 = vrot.lane.b32.xlu1 %v3327_v32, %s4584_s5  ;;  %s3405_s5 = scalar_lea.sflag [#allocation3], %s1038_s2 }
0x18b8   : > { %v3329_v33 = vpop.permute.xlu1 %3328 }
0x18b9   : > { %4136 = vmatmul.mubr.msk.f32.vlgmr.msra.gmra.mrb[34].mxu1 %vm1085_vm1, %v3329_v33 }
0x198c   : > { %v3398_v10 = vpop.f32.mrb[34].mxu1 }
0x198d   : > { %v3399_v36 = vadd.f32 %v3398_v10, %v3325_v35  ;;  %v4137_v37 = vpop.f32.mrb[35].mxu1 }
0x198f   : > { %3403 = vst.msk [vmem:[%s1039_s6] sm:$0x1] %vm3402_vm7, %v3399_v36 }
0x1990   : > { %4496 = shalt.err (!%p4493_p3)
}
0x1991   : > { %s4497_s6 = scalar_lea.hbm %s5125_s4, 16  ;;  %s4501_s2 = scalar_lea.hbm %s4759_s12, 32 }
0x1992   : > { %p4498_p4 = scmp.ne.s32.totalorder %s5125_s4, %s4497_s6  ;;  %p4502_p9 = scmp.lt.u32.totalorder %s5125_s4, %s4759_s12 }
0x1993   : > { %p4503_p10 = scmp.lt.u32.totalorder %s4501_s2, %s4497_s6  ;;  %p4505_p12 = scmp.lt.u32.totalorder %s4497_s6, %s5125_s4 }
0x1994   : > { %p4499_p7 = pnand %p4498_p4, %p4799_p5 }
0x1995   : > { %p4504_p11 = por %p4503_p10, %p4502_p9 }
0x1996   : > { %p4500_p8 = pneg %p4499_p7 }
0x1997   : > { %p4506_p0 = por %p4505_p12, %p4504_p11 }
0x1999   : > { %p4507_p13 = pnand %p4506_p0, %p4500_p8 }
0x199b   : > { %4510 = shalt.err (!%p4507_p13)
}
0x199c   : > { %4358 = dma.vmem_to_hbm [thread:$0]  (%p4799_p5), %s5127_s8, 16, %s5125_s4, %s3405_s5  }
0x199d PF: > { %p4364_p1 = scmp.ge.s32.totalorder %s4545_s15, 2  ;;  %s3429_s9 = sand.u32 1, %s4533_s7  }
0x199e   : > { %s3430_s13 = scalar_lea.sflag [#allocation3], %s3429_s9 }
0x199f   : > { %p4361_p2 = pnand %p4364_p1, %p4803_p6 }
0x19a1   : > { %4528 = dma.done.wait (!%p4361_p2), %s3430_s13, 16  }
0x19a2   : > { %4530 = vsyncadd (!%p4361_p2), %s3430_s13, 4294967280  ;;  %p77_p3 = scmp.ge.s32.totalorder %s4786_s18, 4   ;;  %s5229_s7 = smov %s4537_s10 }
0x19a3   : > { %s5230_s10 = smov %s4541_s11  ;;  %s5231_s11 = smov %s4797_s26 }
0x19a4   : > { %s5232_s15 = smov %s4786_s18  ;;  %79 = sbr.rel (!%p77_p3) target bundleno = 62 (0x3e), region = 226 }
0x19ab   :  { %3434 = vsyncpa [#allocation3], 1 }
0x19ac   :  { %3436 = vsyncpa [#allocation3 + $0x1], 1 }

</bundles_post_ra>
